<compile_context>
chip_gen: v7x
topology: tpu7x:2x2x1
jax: 0.10.0
libtpu: 0.0.40
codegen_flags: <defaults>
</compile_context>

<pallas_src>
import jax
import jax.numpy as jnp
from jax import lax
from jax.experimental import pallas as pl
from jax.experimental.pallas import tpu as pltpu


# ---------------------------------------------------------------------------
# small helpers
# ---------------------------------------------------------------------------
def _round_up(v, m):
    return -(-v // m) * m


def _round_down(v, m):
    return (v // m) * m


def _vmem_capacity_bytes():
    """Physical VMEM per TensorCore (v5e/v6e: 128 MiB, v7x: 64 MiB)."""
    try:
        cap = getattr(pltpu.get_tpu_info(), "vmem_capacity_bytes", None)
        if cap:
            return int(cap)
    except Exception:
        pass
    return 64 * 1024 * 1024          # conservative (v7x) if the query fails


def _vmem_budget_bytes():
    cap = _vmem_capacity_bytes()
    # leave headroom for compiler-internal scratch; never request > physical
    return min(cap - 8 * 1024 * 1024, int(0.875 * cap))


_SINGLE_BUFFER_OK = None


def _single_buffer_supported():
    """Probe once whether pipeline_mode=pl.Buffered(1) is accepted on this JAX."""
    global _SINGLE_BUFFER_OK
    if _SINGLE_BUFFER_OK is None:
        try:
            def _probe(x_ref, o_ref):
                o_ref[...] = x_ref[...] + 1.0

            out = pl.pallas_call(
                _probe,
                out_shape=jax.ShapeDtypeStruct((16, 128), jnp.float32),
                grid=(2,),
                in_specs=[pl.BlockSpec((8, 128), lambda i: (0, 0),
                                       pipeline_mode=pl.Buffered(1))],
                out_specs=pl.BlockSpec((8, 128), lambda i: (i, 0)),
            )(jnp.zeros((8, 128), jnp.float32))
            jax.block_until_ready(out)
            _SINGLE_BUFFER_OK = True
        except Exception:
            _SINGLE_BUFFER_OK = False
    return _SINGLE_BUFFER_OK


def _const_spec(shape, grid_rank, single_buf):
    """BlockSpec for a grid-invariant operand; single-buffered when supported
    (the fused weight is the biggest VMEM consumer -- don't double-buffer it)."""
    n = len(shape)
    if grid_rank == 1:
        imap = lambda i: (0,) * n
    else:
        imap = lambda i, k: (0,) * n
    if single_buf:
        return pl.BlockSpec(shape, imap, pipeline_mode=pl.Buffered(1))
    return pl.BlockSpec(shape, imap)


def _choose_block_n(N, row_bytes, resident_bytes, vmem_budget, itemsize):
    """Batch tile: as big as VMEM allows (cap 512, near the HBM roofline and
    MXU-row friendly), multiple of 16 in bf16 (sublane packing), and >=2 grid
    steps whenever N > 16 so both v7x TensorCores get work."""
    mult = 16 if itemsize < 4 else 8
    avail = vmem_budget - resident_bytes
    if avail <= 0:
        max_rows = mult
    else:
        max_rows = max(mult, _round_down(avail // (2 * row_bytes), mult))
    cap = min(512, max_rows)
    if N <= 16:
        return N                              # one block; full-dim => always legal
    two_step = _round_up(_round_up(N, 2) // 2, mult)     # ceil(N/2) rounded to mult
    bn = two_step if two_step <= cap else cap
    return min(bn, N)


def _choose_block_k(K, C, HW, E, itemsize, vmem_budget, w_buf):
    """K tile for the fused GEMM.  Full K while the fused weight fits in half
    the VMEM budget; otherwise a channel tile ck*HW with ck a multiple of 128
    dividing C (keeps the x-block lane dim %128 and the last K block dense)."""
    full_bytes = w_buf * K * E * itemsize
    if 2 * full_bytes <= vmem_budget or C % 128 != 0:
        # TODO(synk): if C is not a multiple of 128 and the weight still busts
        # VMEM, only block_n shrinking remains; prefer the two-stage path there.
        return K
    best = 128
    for ck in range(128, C + 1, 128):
        if C % ck:
            continue
        if 4 * (2 * ck * HW * E * itemsize) <= vmem_budget:   # streamed, 2 bufs, <=1/4 budget
            best = ck
    return best * HW


# ---------------------------------------------------------------------------
# kernels
# ---------------------------------------------------------------------------
def _fused_gemm_kernel(x_ref, w_ref, b_ref, out_ref):
    # x:(bn,K)  w:(K,E) fused dw*BN1*1x1*BN2  b:(1,E) f32  out:(bn,E) f32
    out_ref[...] = (
        jnp.dot(x_ref[...], w_ref[...], preferred_element_type=jnp.float32)
        + b_ref[...]
    ).astype(out_ref.dtype)


def _fused_gemm_ktile_kernel(x_ref, w_ref, b_ref, out_ref, acc_ref):
    # grid = (n_blocks, k_blocks); innermost "arbitrary" K axis, f32 accumulator.
    k = pl.program_id(1)

    @pl.when(k == 0)
    def _init():
        acc_ref[...] = jnp.zeros_like(acc_ref)

    acc_ref[...] += jnp.dot(x_ref[...], w_ref[...],
                            preferred_element_type=jnp.float32)

    @pl.when(k == pl.num_programs(1) - 1)
    def _finalize():
        out_ref[...] = (acc_ref[...] + b_ref[...]).astype(out_ref.dtype)


def _two_stage_kernel(x_ref, wdw_ref, wlin_ref, b_ref, out_ref):
    # x:(bn,C,HW)  wdw:(C,HW)=w_dw*s1  wlin:(C,E)=w_lin^T*s2  b:(1,E) f32
    prod = x_ref[...].astype(jnp.float32) * wdw_ref[...].astype(jnp.float32)[None, :, :]
    y1 = jnp.sum(prod, axis=-1)                            # (bn, C) f32: depthwise + BN1
    out_ref[...] = (
        jnp.dot(y1.astype(wlin_ref.dtype), wlin_ref[...],
                preferred_element_type=jnp.float32)
        + b_ref[...]
    ).astype(out_ref.dtype)


# ---------------------------------------------------------------------------
# path builders
# ---------------------------------------------------------------------------
def _fused_path(x_nchw, wdw, wl, bias, cdt, block_n, block_k, vmem_budget):
    N, C, H, W = x_nchw.shape
    HW = H * W
    K = C * HW
    E = wl.shape[1]
    itemsize = jnp.dtype(cdt).itemsize

    # TODO(synk): cache w_fused per checkpoint instead of rebuilding every call;
    # under jit it is a trace-time constant, but eager callers pay a K*E
    # materialization + HBM round-trip each forward.
    w_fused = (wdw[:, :, None] * wl[:, None, :]).reshape(K, E).astype(cdt)
    # x as (N, K): free view of contiguous NCHW (K order = c*HW + hw).  The cast
    # is a no-op when activations already arrive in bf16 (typical in production).
    x2d = x_nchw.reshape(N, K).astype(cdt)

    single_buf = _single_buffer_supported()
    w_buf = 1 if single_buf else 2

    if block_k is None:
        block_k = _choose_block_k(K, C, HW, E, itemsize, vmem_budget, w_buf)
    assert K % block_k == 0 and (block_k == K or block_k % 128 == 0)
    ktiled = block_k < K

    if ktiled:
        row_bytes = block_k * itemsize + 2 * E * 4               # x block + out + acc row
        resident = 2 * block_k * E * itemsize + w_buf * E * 4    # streamed weight + bias
    else:
        row_bytes = K * itemsize + E * 4
        resident = w_buf * (K * E * itemsize + E * 4)
    if block_n is None:
        block_n = _choose_block_n(N, row_bytes, resident, vmem_budget, itemsize)

    est = 2 * block_n * row_bytes + resident
    vmem_limit = int(min(vmem_budget, max(2 * est, 32 * 1024 * 1024)))

    cost = pl.CostEstimate(
        flops=2 * N * K * E,
        transcendentals=0,
        bytes_accessed=N * K * itemsize + K * E * itemsize + N * E * 4 + E * 4,
    )

    if not ktiled:
        return pl.pallas_call(
            _fused_gemm_kernel,
            out_shape=jax.ShapeDtypeStruct((N, E), jnp.float32),
            grid=(pl.cdiv(N, block_n),),
            in_specs=[
                pl.BlockSpec((block_n, K), lambda i: (i, 0)),    # streamed activations
                _const_spec((K, E), 1, single_buf),              # resident fused weight
                _const_spec((1, E), 1, single_buf),              # resident fused bias
            ],
            out_specs=pl.BlockSpec((block_n, E), lambda i: (i, 0)),
            compiler_params=pltpu.CompilerParams(
                dimension_semantics=("parallel",),
                vmem_limit_bytes=vmem_limit),
            cost_estimate=cost,
        )(x2d, w_fused, bias)

    return pl.pallas_call(
        _fused_gemm_ktile_kernel,
        out_shape=jax.ShapeDtypeStruct((N, E), jnp.float32),
        grid=(pl.cdiv(N, block_n), K // block_k),
        in_specs=[
            pl.BlockSpec((block_n, block_k), lambda i, k: (i, k)),
            pl.BlockSpec((block_k, E), lambda i, k: (k, 0)),
            _const_spec((1, E), 2, single_buf),
        ],
        out_specs=pl.BlockSpec((block_n, E), lambda i, k: (i, 0)),
        scratch_shapes=[pltpu.VMEM((block_n, E), jnp.float32)],
        compiler_params=pltpu.CompilerParams(
            dimension_semantics=("parallel", "arbitrary"),
            vmem_limit_bytes=vmem_limit),
        cost_estimate=cost,
    )(x2d, w_fused, bias)


def _two_stage_path(x_nchw, wdw, wl, bias, cdt, block_n, vmem_budget):
    N, C, H, W = x_nchw.shape
    HW = H * W
    E = wl.shape[1]
    itemsize = jnp.dtype(cdt).itemsize

    x3d = x_nchw.reshape(N, C, HW).astype(cdt)   # free view; HW rides the lane dim
    wdw_c = wdw.astype(cdt)                      # (C, HW)
    wl_c = wl.astype(cdt)                        # (C, E)

    single_buf = _single_buffer_supported()
    w_buf = 1 if single_buf else 2

    lanes = _round_up(HW, 128)                   # VMEM pads the 49-wide lane dim to 128
    row_bytes = C * lanes * itemsize + E * 4
    resident = w_buf * (C * lanes * itemsize + C * E * itemsize + E * 4)
    if block_n is None:
        block_n = _choose_block_n(N, row_bytes, resident, vmem_budget, itemsize)

    est = 2 * block_n * row_bytes + resident
    vmem_limit = int(min(vmem_budget, max(2 * est, 32 * 1024 * 1024)))

    cost = pl.CostEstimate(
        flops=2 * N * C * HW + 2 * N * C * E,
        transcendentals=0,
        bytes_accessed=(N * C * HW * itemsize + C * HW * itemsize
                        + C * E * itemsize + N * E * 4 + E * 4),
    )

    return pl.pallas_call(
        _two_stage_kernel,
        out_shape=jax.ShapeDtypeStruct((N, E), jnp.float32),
        grid=(pl.cdiv(N, block_n),),
        in_specs=[
            pl.BlockSpec((block_n, C, HW), lambda i: (i, 0, 0)),  # streamed activations
            _const_spec((C, HW), 1, single_buf),                  # folded depthwise weight
            _const_spec((C, E), 1, single_buf),                   # folded 1x1 weight
            _const_spec((1, E), 1, single_buf),                   # fused bias
        ],
        out_specs=pl.BlockSpec((block_n, E), lambda i: (i, 0)),
        compiler_params=pltpu.CompilerParams(
            dimension_semantics=("parallel",),
            vmem_limit_bytes=vmem_limit),
        cost_estimate=cost,
    )(x3d, wdw_c, wl_c, bias)


# ---------------------------------------------------------------------------
# public entry point
# ---------------------------------------------------------------------------
def global_depthwise_conv(x_nchw, w_dw, bn1, w_lin, bn2, *,
                          compute_dtype=jnp.bfloat16, block_n=None,
                          block_k=None, force_path=None):
    """GlobalDepthwiseConv forward (eval-mode BatchNorm).

    x_nchw: (N, C, H, W); w_dw: (C, 1, H, W) depthwise weight whose kernel
    equals the spatial extent (valid conv -> 1x1); w_lin: (E, C, 1, 1) 1x1 conv
    weight; bn1/bn2: dicts of gamma, beta, mean, var, eps (running stats).

    compute_dtype: dtype for x and the folded weights (default bf16 -- the
    kernels are HBM-bound on v5e/v6e/v7x; accumulation and the bias stay f32).
    Pass None to keep the input dtype.
    force_path: None (auto) | "fused" | "two_stage".
    """
    N, C, H, W = x_nchw.shape
    E = w_lin.shape[0]
    HW = H * W
    assert w_dw.shape == (C, 1, H, W), "kernel must equal spatial extent"
    assert w_lin.shape == (E, C, 1, 1)

    f32 = jnp.float32
    # ---- trace-time constant folding of both BatchNorms (always in f32) ----
    s1 = bn1["gamma"].astype(f32) / jnp.sqrt(bn1["var"].astype(f32) + bn1["eps"])
    b1 = bn1["beta"].astype(f32) - bn1["mean"].astype(f32) * s1
    s2 = bn2["gamma"].astype(f32) / jnp.sqrt(bn2["var"].astype(f32) + bn2["eps"])
    b2 = bn2["beta"].astype(f32) - bn2["mean"].astype(f32) * s2

    wl = jnp.transpose(w_lin.reshape(E, C).astype(f32)) * s2[None, :]   # (C, E), BN2 folded
    wdw = w_dw.reshape(C, HW).astype(f32) * s1[:, None]                 # (C, HW), BN1 folded
    bias = (jnp.dot(b1, wl, precision=lax.Precision.HIGHEST) + b2).reshape(1, E)  # (1,E) f32

    cdt = jnp.dtype(compute_dtype) if compute_dtype is not None else jnp.dtype(x_nchw.dtype)
    vmem_budget = _vmem_budget_bytes()

    if force_path == "fused":
        use_fused = True
    elif force_path == "two_stage":
        use_fused = False
    else:
        # Fused single-GEMM only while the 49x-inflated weight is amortized over
        # a large batch (N >= 2E) and the extra MXU FLOPs stay under the HBM
        # roofline on every supported generation (conservative cut E <= 256;
        # bf16 ridge ~240 v5e / ~310 v7x / ~650 v6e flops/byte).
        use_fused = (N >= 2 * E) and (E <= 256)

    if use_fused:
        return _fused_path(x_nchw, wdw, wl, bias, cdt, block_n, block_k, vmem_budget)
    return _two_stage_path(x_nchw, wdw, wl, bias, cdt, block_n, vmem_budget)


# ---------------------------------------------------------------------------
# reference + test harness
# ---------------------------------------------------------------------------
def _reference(x_nchw, w_dw, bn1, w_lin, bn2):
    N, C, H, W = x_nchw.shape
    E = w_lin.shape[0]
    y1 = jnp.einsum("nchw,chw->nc", x_nchw, w_dw.reshape(C, H, W),
                    precision=lax.Precision.HIGHEST)
    s1 = bn1["gamma"] / jnp.sqrt(bn1["var"] + bn1["eps"])
    y1 = (y1 - bn1["mean"]) * s1 + bn1["beta"]
    y2 = jnp.dot(y1, jnp.transpose(w_lin.reshape(E, C)),
                 precision=lax.Precision.HIGHEST)
    s2 = bn2["gamma"] / jnp.sqrt(bn2["var"] + bn2["eps"])
    return (y2 - bn2["mean"]) * s2 + bn2["beta"]


def _make_inputs(key, N, C, E, H, W, eps=1e-5):
    kx, kdw, klin, k1, k2, k3, k4, k5, k6, k7, k8 = jax.random.split(key, 11)
    x = jax.random.normal(kx, (N, C, H, W), dtype=jnp.float32)
    w_dw = jax.random.normal(kdw, (C, 1, H, W), dtype=jnp.float32) * 0.05
    w_lin = jax.random.normal(klin, (E, C, 1, 1), dtype=jnp.float32) * 0.05
    bn1 = dict(gamma=1.0 + 0.1 * jax.random.normal(k1, (C,), jnp.float32),
               beta=0.1 * jax.random.normal(k2, (C,), jnp.float32),
               mean=0.05 * jax.random.normal(k3, (C,), jnp.float32),
               var=jnp.abs(1.0 + 0.1 * jax.random.normal(k4, (C,), jnp.float32)),
               eps=eps)
    bn2 = dict(gamma=1.0 + 0.1 * jax.random.normal(k5, (E,), jnp.float32),
               beta=0.1 * jax.random.normal(k6, (E,), jnp.float32),
               mean=0.05 * jax.random.normal(k7, (E,), jnp.float32),
               var=jnp.abs(1.0 + 0.1 * jax.random.normal(k8, (E,), jnp.float32)),
               eps=eps)
    return x, w_dw, w_lin, bn1, bn2


if __name__ == "__main__":
    H, W = 7, 7
    key = jax.random.PRNGKey(0)
    k_a, k_b, k_c = jax.random.split(key, 3)

    # --- config A: widen_factor=0.25 -> C=128, E=128, small (inference) batch ---
    x, w_dw, w_lin, bn1, bn2 = _make_inputs(k_a, 8, 128, 128, H, W)
    ref = _reference(x, w_dw, bn1, w_lin, bn2)

    # default call: bf16 compute; heuristic picks the two-stage kernel (N < 2E,
    # so the 49x fused weight is never materialized).
    out = jax.block_until_ready(global_depthwise_conv(x, w_dw, bn1, w_lin, bn2))
    assert out.shape == (8, 128) and out.dtype == jnp.float32
    assert jnp.allclose(out, ref, atol=3e-2, rtol=3e-2), "bf16 two-stage mismatch"

    # f32, forced fused single-GEMM path (tight tolerance).
    out_f = jax.block_until_ready(global_depthwise_conv(
        x, w_dw, bn1, w_lin, bn2, compute_dtype=None, force_path="fused"))
    assert jnp.allclose(out_f, ref, atol=2e-3, rtol=2e-3), "f32 fused mismatch"

    # f32, forced two-stage path.
    out_t = jax.block_until_ready(global_depthwise_conv(
        x, w_dw, bn1, w_lin, bn2, compute_dtype=None, force_path="two_stage"))
    assert jnp.allclose(out_t, ref, atol=2e-3, rtol=2e-3), "f32 two-stage mismatch"

    # --- config B: larger batch -> heuristic picks the fused GEMM, grid >= 2 ---
    xb, w_dwb, w_linb, bn1b, bn2b = _make_inputs(k_b, 256, 128, 128, H, W)
    refb = _reference(xb, w_dwb, bn1b, w_linb, bn2b)
    outb = jax.block_until_ready(global_depthwise_conv(xb, w_dwb, bn1b, w_linb, bn2b))
    assert outb.shape == (256, 128)
    assert jnp.allclose(outb, refb, atol=3e-2, rtol=3e-2), "bf16 fused mismatch"

    # --- config C: ragged N + forced K-tiled fused accumulator path (f32) -----
    xc, w_dwc, w_linc, bn1c, bn2c = _make_inputs(k_c, 12, 256, 128, H, W)
    refc = _reference(xc, w_dwc, bn1c, w_linc, bn2c)
    outc = jax.block_until_ready(global_depthwise_conv(
        xc, w_dwc, bn1c, w_linc, bn2c, compute_dtype=None, force_path="fused",
        block_n=8, block_k=128 * H * W))
    assert outc.shape == (12, 128)
    assert jnp.allclose(outc, refc, atol=2e-3, rtol=2e-3), "f32 K-tiled fused mismatch"

    print("KERNEL_OK")
</pallas_src>

<mosaic_0001>
module attributes {stable_mosaic.version = 11 : i64} {
  func.func @_probe(%arg0: i32, %arg1: memref<8x128xf32, #tpu.memory_space<vmem>>, %arg2: memref<8x128xf32, #tpu.memory_space<vmem>>) attributes {dimension_semantics = [#tpu.dimension_semantics<arbitrary>], iteration_bounds = array<i64: 2>, scalar_prefetch = 0 : i64, scratch_operands = 0 : i64, tpu.core_type = #tpu.core_type<tc>, window_params = [{pipeline_mode = #tpu.pipeline_mode<synchronous>, transform_indices = @transform_0, window_bounds = array<i64: 8, 128>}, {transform_indices = @transform_1, window_bounds = array<i64: 8, 128>}]} {
    %c0 = arith.constant 0 : index
    %c0_0 = arith.constant 0 : index
    %0 = vector.load %arg1[%c0, %c0_0] : memref<8x128xf32, #tpu.memory_space<vmem>>, vector<8x128xf32>
    %cst = arith.constant 1.000000e+00 : f32
    %1 = vector.broadcast %cst : f32 to vector<8x128xf32>
    %2 = arith.addf %0, %1 : vector<8x128xf32>
    %c0_1 = arith.constant 0 : index
    %c0_2 = arith.constant 0 : index
    %3 = vector.load %arg2[%c0_1, %c0_2] : memref<8x128xf32, #tpu.memory_space<vmem>>, vector<8x128xf32>
    tpu.vector_store %arg2[%c0_1, %c0_2], %2 {strides = array<i32>} : memref<8x128xf32, #tpu.memory_space<vmem>>, vector<8x128xf32>,
    return
  }
  func.func @transform_0(%arg0: i32) -> (i32, i32) {
    %c0_i32 = arith.constant 0 : i32
    %c0_i32_0 = arith.constant 0 : i32
    %c0_i32_1 = arith.constant 0 : i32
    return %c0_i32, %c0_i32_0 : i32, i32
  }
  func.func @transform_1(%arg0: i32) -> (i32, i32) {
    %c0_i32 = arith.constant 0 : i32
    %c0_i32_0 = arith.constant 0 : i32
    return %arg0, %c0_i32 : i32, i32
  }
}

module attributes {stable_mosaic.version = 11 : i64} {
  func.func @_two_stage_kernel(%arg0: i32, %arg1: memref<8x128x49xbf16, #tpu.memory_space<vmem>>, %arg2: memref<128x49xbf16, #tpu.memory_space<vmem>>, %arg3: memref<128x128xbf16, #tpu.memory_space<vmem>>, %arg4: memref<1x128xf32, #tpu.memory_space<vmem>>, %arg5: memref<8x128xf32, #tpu.memory_space<vmem>>) attributes {dimension_semantics = [#tpu.dimension_semantics<parallel>], iteration_bounds = array<i64: 1>, scalar_prefetch = 0 : i64, scratch_operands = 0 : i64, tpu.core_type = #tpu.core_type<tc>, window_params = [{transform_indices = @transform_0, window_bounds = array<i64: 8, 128, 49>}, {pipeline_mode = #tpu.pipeline_mode<synchronous>, transform_indices = @transform_1, window_bounds = array<i64: 128, 49>}, {pipeline_mode = #tpu.pipeline_mode<synchronous>, transform_indices = @transform_2, window_bounds = array<i64: 128, 128>}, {pipeline_mode = #tpu.pipeline_mode<synchronous>, transform_indices = @transform_3, window_bounds = array<i64: 1, 128>}, {transform_indices = @transform_4, window_bounds = array<i64: 8, 128>}]} {
    %c0 = arith.constant 0 : index
    %c0_0 = arith.constant 0 : index
    %c0_1 = arith.constant 0 : index
    %0 = vector.load %arg1[%c0, %c0_0, %c0_1] : memref<8x128x49xbf16, #tpu.memory_space<vmem>>, vector<8x128x49xbf16>
    %1 = arith.extf %0 : vector<8x128x49xbf16> to vector<8x128x49xf32>
    %c0_2 = arith.constant 0 : index
    %c0_3 = arith.constant 0 : index
    %2 = vector.load %arg2[%c0_2, %c0_3] : memref<128x49xbf16, #tpu.memory_space<vmem>>, vector<128x49xbf16>
    %3 = arith.extf %2 : vector<128x49xbf16> to vector<128x49xf32>
    %4 = vector.shape_cast %3 : vector<128x49xf32> to vector<1x128x49xf32>
    %5 = vector.broadcast %4 : vector<1x128x49xf32> to vector<8x128x49xf32>
    %6 = arith.mulf %1, %5 : vector<8x128x49xf32>
    %cst = arith.constant dense<0.000000e+00> : vector<8x128xf32>
    %7 = vector.multi_reduction <add>, %6, %cst [2] : vector<8x128x49xf32> to vector<8x128xf32>
    %8 = arith.truncf %7 : vector<8x128xf32> to vector<8x128xbf16>
    %c0_4 = arith.constant 0 : index
    %c0_5 = arith.constant 0 : index
    %9 = vector.load %arg3[%c0_4, %c0_5] : memref<128x128xbf16, #tpu.memory_space<vmem>>, vector<128x128xbf16>
    %cst_6 = arith.constant dense<0.000000e+00> : vector<8x128xf32>
    %10 = tpu.matmul %8, %9, %cst_6 {dimension_numbers = #tpu.dot_dimension_numbers<[1], [0], [0], [1], [0, 0, 1, 1], [], []>} : vector<8x128xbf16>, vector<128x128xbf16>, vector<8x128xf32> -> vector<8x128xf32>
    %c0_7 = arith.constant 0 : index
    %c0_8 = arith.constant 0 : index
    %11 = vector.load %arg4[%c0_7, %c0_8] : memref<1x128xf32, #tpu.memory_space<vmem>>, vector<1x128xf32>
    %12 = vector.broadcast %11 : vector<1x128xf32> to vector<8x128xf32>
    %13 = arith.addf %10, %12 : vector<8x128xf32>
    %c0_9 = arith.constant 0 : index
    %c0_10 = arith.constant 0 : index
    %14 = vector.load %arg5[%c0_9, %c0_10] : memref<8x128xf32, #tpu.memory_space<vmem>>, vector<8x128xf32>
    tpu.vector_store %arg5[%c0_9, %c0_10], %13 {strides = array<i32>} : memref<8x128xf32, #tpu.memory_space<vmem>>, vector<8x128xf32>,
    return
  }
  func.func @transform_0(%arg0: i32) -> (i32, i32, i32) {
    %c0_i32 = arith.constant 0 : i32
    %c0_i32_0 = arith.constant 0 : i32
    %c0_i32_1 = arith.constant 0 : i32
    return %arg0, %c0_i32, %c0_i32_0 : i32, i32, i32
  }
  func.func @transform_1(%arg0: i32) -> (i32, i32) {
    %c0_i32 = arith.constant 0 : i32
    %c0_i32_0 = arith.constant 0 : i32
    %c0_i32_1 = arith.constant 0 : i32
    return %c0_i32, %c0_i32_0 : i32, i32
  }
  func.func @transform_2(%arg0: i32) -> (i32, i32) {
    %c0_i32 = arith.constant 0 : i32
    %c0_i32_0 = arith.constant 0 : i32
    %c0_i32_1 = arith.constant 0 : i32
    return %c0_i32, %c0_i32_0 : i32, i32
  }
  func.func @transform_3(%arg0: i32) -> (i32, i32) {
    %c0_i32 = arith.constant 0 : i32
    %c0_i32_0 = arith.constant 0 : i32
    %c0_i32_1 = arith.constant 0 : i32
    return %c0_i32, %c0_i32_0 : i32, i32
  }
  func.func @transform_4(%arg0: i32) -> (i32, i32) {
    %c0_i32 = arith.constant 0 : i32
    %c0_i32_0 = arith.constant 0 : i32
    return %arg0, %c0_i32 : i32, i32
  }
}

</mosaic_0001>

<bundles_post_ra>
// kernel: tpu_custom_call.1
= control target key start
LH: loop header
LB: loop body
LE: loop exit
PB: predicated region body
PF: predicated region fallthrough
CT: control target
= control target key end

     0   :  { %6 = vsyncpa [#allocation3], 0  ;;  %s482_s0 = inlined_call_operand.hbm [shape: f32[8,128], index: 0, kind: input, shape index: {}]   ;;  %s483_s1 = inlined_call_operand.hbm [shape: f32[16,128], index: 1, kind: output, shape index: {}]  }
   0x1   :  { %7 = vsyncpa [#allocation4], 0 }
   0x2   :  { %9 = vsyncpa [#allocation4 + $0x1], 0  ;;  %s352_s6 = smov 0   ;;  %s354_s7 = smov 0  }
   0x3   :  { %s356_s8 = smov 0   ;;  %s358_s9 = smov 0  }
   0x4 LB: > { %s373_s10 = sadd.s32 4294967295, %s338_s9   ;;  %s184_s11 = sadd.s32 4294967294, %s338_s9   ;;  %s338_s9 = sphi %s358_s9, %s499_s9   ;;  %s334_s8 = sphi %s356_s8, %s498_s8   ;;  %s330_s7 = sphi %s354_s7, %s497_s7   ;;  %s326_s6 = sphi %s352_s6, %s496_s6  }
   0x5   : > { %s377_s12 = sadd.s32 1, %s338_s9   ;;  %s43_s13 = sadd.s32 1, %s334_s8 }
   0x6   : > { %s40_s14 = ssub.s32 %s338_s9, %s377_s12  ;;  %p53_p0 = scmp.ne.s32.totalorder %s334_s8, %s330_s7 }
   0x7   : > { %p41_p1 = scmp.eq.s32.totalorder %s40_s14, 0  ;;  %p54_p2 = scmp.eq.s32.totalorder %s373_s10, 1 }
   0x8   : > { %p59_p3 = scmp.ne.s32.totalorder %s330_s7, %s326_s6  ;;  %p60_p4 = scmp.eq.s32.totalorder %s184_s11, 1 }
   0x9   : > { %s388_s15 = scalar_select %p41_p1, %s334_s8, %s43_s13  }
   0xa   : > { %p390_p5 = por %p54_p2, %p53_p0  ;;  %p394_p6 = por %p60_p4, %p59_p3 }
   0xb   : > { %p185_p7 = scmp.ge.s32.totalorder %s338_s9, 1  ;;  %p67_p8 = scmp.lt.s32.totalorder %s338_s9, 3 }
   0xc   : > { %s487_s16 = scalar_select %p390_p5, 1, 0 }
   0xd   : > { %s488_s17 = scalar_select %p394_p6, 1, 0 }
   0xe   : > { %p484_p9 = scmp.eq.s32.totalorder %s373_s10, 0  ;;  %p401_p10 = pnand %p185_p7, %p67_p8 }
   0xf   : > { %s340_s19 = smov [#allocation2]   ;;  %s244_s24 = scalar_lea.hbm %s482_s0, 128 }
  0x10   : > { %s489_s18 = scalar_select %p401_p10, 1, 0 }
  0x11   : > { %s80_s20 = sshll.u32 %s340_s19, 4  ;;  %p200_p11 = pneg %p401_p10  ;;  %s81_s20 = int_to_ptr.vmem [resolvable:$true] %s80_s20 }
  0x12   : > { %p245_p13 = scmp.ne.s32.totalorder %s482_s0, %s244_s24  ;;  %p251_p3 = scmp.lt.u32.totalorder %s244_s24, %s482_s0 }
  0x13   : > { %p409_p12 = pnand %p484_p9, %p200_p11 }
  0x15   : > { %p246_p0 = pneg %p409_p12 }
  0x17   : > { %p247_p1 = pnand %p246_p0, %p245_p13 }
  0x19   : > { %p248_p2 = pneg %p247_p1 }
  0x1b   : > { %p253_p4 = pnand %p251_p3, %p248_p2 }
  0x1d   : > { %256 = shalt.err (!%p253_p4)
}
  0x1e   : > { %s257_s29 = scalar_lea.vmem %s81_s20, 128  ;;  %p265_p9 = scmp.lt.s32.totalorder %s81_s20, %s81_s20 }
  0x1f   : > { %p258_p7 = scmp.ne.s32.totalorder %s81_s20, %s257_s29  ;;  %p266_p6 = scmp.lt.s32.totalorder %s257_s29, %s257_s29 }
  0x21   : > { %p260_p8 = pnand %p258_p7, %p246_p0  ;;  %p267_p5 = por %p266_p6, %p265_p9 }
  0x23   : > { %p261_p11 = pneg %p260_p8 }
  0x25   : > { %p268_p10 = pnand %p267_p5, %p261_p11 }
  0x27   : > { %271 = shalt.err (!%p268_p10)
}
  0x28   : > { %203 = dma.hbm_to_vmem [thread:$0]  (!%p409_p12), %s482_s0, 128, %s81_s20, [#allocation3]  }
  0x29   : > { %p491_p13 = scmp.ne.s32.totalorder %s489_s18, 0 }
  0x2a   : > { %p492_p1 = scmp.eq.s32.totalorder (!%p491_p13), %s373_s10, 0 }
  0x2b   : > { %93 = sbr.rel (%p491_p13) target bundleno = 77 (0x4d), region = 24 }
  0x32   : > { %317 = dma.done.wait (%p492_p1), [#allocation3], 128   ;;  %p493_p0 = pmov %p492_p1 }
  0x33   : > { %s105_s3 = sand.u32 1, %s330_s7   ;;  %s191_s13 = sshll.u32 %s373_s10, 7  ;;  %v108_v0 = vld [vmem:[#allocation2] sm:$0xff] }
  0x34   : > { %319 = vsyncadd (%p493_p0), [#allocation3], 4294967168  ;;  %s189_s4 = sshll.u32 %s105_s3, 3  ;;  %v109_v1 = vadd.f32 1.0, %v108_v0  ;;  %s442_s19 = scalar_lea.hbm %s483_s1, %s191_s13 }
  0x35   : > { %s107_s5 = scalar_lea.vmem [#allocation5], %s189_s4  ;;  %s112_s20 = scalar_lea.sflag [#allocation4], %s105_s3 }
  0x36   : > { %s125_s11 = sshll.u32 %s107_s5, 4  ;;  %110 = vst [vmem:[%s107_s5] sm:$0xff] %v109_v1  ;;  %p494_p6 = scmp.ne.s32.totalorder %s487_s16, 0  ;;  %s437_s11 = int_to_ptr.vmem [resolvable:$true] %s125_s11 }
  0x37   : > { %s272_s21 = scalar_lea.vmem %s437_s11, 128  ;;  %s341_s10 = smov [#allocation5]  }
  0x38   : > { %p273_p5 = scmp.ne.s32.totalorder %s437_s11, %s272_s21  ;;  %s276_s22 = sshll.u32 %s341_s10, 4  ;;  %s277_s22 = int_to_ptr.vmem [resolvable:$false] %s276_s22 }
  0x39   : > { %s278_s23 = scalar_lea.vmem %s277_s22, 256  ;;  %p279_p12 = scmp.lt.s32.totalorder %s437_s11, %s277_s22 }
  0x3a   : > { %p274_p9 = pnand %p273_p5, %p494_p6  ;;  %p280_p2 = scmp.lt.s32.totalorder %s278_s23, %s272_s21 }
  0x3c   : > { %p275_p10 = pneg %p274_p9  ;;  %p281_p3 = por %p280_p2, %p279_p12 }
  0x3e   : > { %p282_p4 = pnand %p281_p3, %p275_p10 }
  0x40   : > { %285 = shalt.err (!%p282_p4)
}
  0x41   : > { %s286_s24 = scalar_lea.hbm %s442_s19, 128  ;;  %s290_s27 = scalar_lea.hbm %s483_s1, 256 }
  0x42   : > { %p287_p7 = scmp.ne.s32.totalorder %s442_s19, %s286_s24  ;;  %p291_p13 = scmp.lt.u32.totalorder %s442_s19, %s483_s1 }
  0x43   : > { %p292_p1 = scmp.lt.u32.totalorder %s290_s27, %s286_s24  ;;  %p294_p5 = scmp.lt.u32.totalorder %s286_s24, %s442_s19 }
  0x44   : > { %p288_p8 = pnand %p287_p7, %p494_p6 }
  0x45   : > { %p293_p0 = por %p292_p1, %p291_p13 }
  0x46   : > { %p289_p11 = pneg %p288_p8 }
  0x47   : > { %p295_p9 = por %p294_p5, %p293_p0 }
  0x49   : > { %p296_p10 = pnand %p295_p9, %p289_p11 }
  0x4b   : > { %299 = shalt.err (!%p296_p10)
}
  0x4c   : > { %198 = dma.vmem_to_hbm [thread:$0]  (%p494_p6), %s437_s11, 128, %s442_s19, %s112_s20  }
  0x4d PF: > { %p210_p12 = scmp.ge.s32.totalorder %s338_s9, 2  ;;  %s137_s30 = sand.u32 1, %s326_s6  }
  0x4e   : > { %p495_p2 = scmp.ne.s32.totalorder %s488_s17, 0  ;;  %s138_s2 = scalar_lea.sflag [#allocation4], %s137_s30 }
  0x50   : > { %p205_p3 = pnand %p210_p12, %p495_p2 }
  0x52   : > { %321 = dma.done.wait (!%p205_p3), %s138_s2, 128  }
  0x53   : > { %323 = vsyncadd (!%p205_p3), %s138_s2, 4294967168  ;;  %p12_p4 = scmp.ge.s32.totalorder %s377_s12, 4   ;;  %s496_s6 = smov %s330_s7 }
  0x54   : > { %s497_s7 = smov %s334_s8  ;;  %s498_s8 = smov %s388_s15 }
  0x55   : > { %s499_s9 = smov %s377_s12  ;;  %14 = sbr.rel (!%p12_p4) target bundleno = 4 (0x4), region = 61 }
  0x5c   :  { %143 = vsyncpa [#allocation3], 1 }
  0x5d   :  { %145 = vsyncpa [#allocation3 + $0x1], 1 }
  0x5e   :  { %146 = vsyncpa [#allocation4], 1 }
  0x5f   :  { %148 = vsyncpa [#allocation4 + $0x1], 1 }

// kernel: tpu_custom_call.1
= control target key start
LH: loop header
LB: loop body
LE: loop exit
PB: predicated region body
PF: predicated region fallthrough
CT: control target
= control target key end

     0   :  { %vm435_vm0 = vcmask 400384   ;;  %s3336_s0 = inlined_call_operand.vmem [shape: bf16[8,128,49], index: 0, kind: input, shape index: {}]   ;;  %s3337_s1 = inlined_call_operand.vmem [shape: bf16[128,49], index: 1, kind: input, shape index: {}]   ;;  %s3338_s2 = inlined_call_operand.vmem [shape: bf16[128,128], index: 2, kind: input, shape index: {}]   ;;  %s3339_s3 = inlined_call_operand.vmem [shape: f32[1,128], index: 3, kind: input, shape index: {}]   ;;  %s3340_s4 = inlined_call_operand.hbm [shape: f32[8,128], index: 4, kind: output, shape index: {}]  }
   0x1   :  { %v2186_v0 = vld [vmem:[%s3336_s0 + $0x40] sm:$0xff]   ;;  %v2179_v7 = vld [vmem:[%s3336_s0 + $0x8] sm:$0xff]   ;;  %v2180_v45 = vld [vmem:[%s3336_s0 + $0x10] sm:$0xff]  }
   0x2   :  { %v2148_v1 = vld [vmem:[%s3337_s1] sm:$0xff]   ;;  %v1925_v3 = vunpack.c.l.bf16 %v2186_v0  ;;  %v1926_v6 = vunpack.c.h.bf16 %v2186_v0  ;;  %v2242_v8 = vld [vmem:[%s3337_s1 + $0x8] sm:$0xff]   ;;  %v1898_v11 = vunpack.c.h.bf16 %v2179_v7  ;;  %v1897_v16 = vunpack.c.l.bf16 %v2179_v7  ;;  %v2243_v46 = vld [vmem:[%s3337_s1 + $0x10] sm:$0xff]  }
   0x3   :  { %v1892_v2 = vld [vmem:[%s3336_s0] sm:$0xff]   ;;  %v2350_v4 = vunpack.c.l.bf16 %v2148_v1  ;;  %v2358_v9 = vunpack.c.h.bf16 %v2148_v1  ;;  %v2360_v12 = vunpack.c.h.bf16 %v2242_v8  ;;  %v2187_v13 = vld [vmem:[%s3336_s0 + $0x48] sm:$0xff]   ;;  %v2367_v17 = vunpack.c.l.bf16 %v2242_v8 }
   0x4   :  { %v1893_v5 = vunpack.c.l.bf16 %v1892_v2  ;;  %v1894_v10 = vunpack.c.h.bf16 %v1892_v2  ;;  %v1930_v22 = vunpack.c.h.bf16 %v2187_v13  ;;  %v1929_v27 = vunpack.c.l.bf16 %v2187_v13  ;;  %v2194_v28 = vld [vmem:[%s3336_s0 + $0x80] sm:$0xff]   ;;  %v2195_v35 = vld [vmem:[%s3336_s0 + $0x88] sm:$0xff]  }
   0x5   :  { %v323_v14 = vmul.f32 %v2350_v4, %v1925_v3  ;;  %v324_v18 = vmul.f32 %v2358_v9, %v1926_v6  ;;  %v310_v23 = vmul.f32 %v2360_v12, %v1898_v11  ;;  %v309_v26 = vmul.f32 %v2367_v17, %v1897_v16  ;;  %v2202_v42 = vld [vmem:[%s3336_s0 + $0xc0] sm:$0xff]  }
   0x6   :  { %v307_v15 = vmul.f32 %v2350_v4, %v1893_v5  ;;  %v308_v19 = vmul.f32 %v2358_v9, %v1894_v10  ;;  %v326_v29 = vmul.f32 %v2360_v12, %v1930_v22  ;;  %v325_v32 = vmul.f32 %v2367_v17, %v1929_v27 }
   0x7   :  { %v484_v20 = vsel %vm435_vm0, %v323_v14, 0.0  ;;  %v487_v24 = vsel %vm435_vm0, %v324_v18, 0.0  ;;  %v445_v30 = vsel %vm435_vm0, %v310_v23, 0.0  ;;  %v442_v31 = vsel %vm435_vm0, %v309_v26, 0.0 }
   0x8   :  { %v436_v21 = vsel %vm435_vm0, %v307_v15, 0.0  ;;  %485 = vadd.xlane.f32.xlu1 %v484_v20  ;;  %v439_v25 = vsel %vm435_vm0, %v308_v19, 0.0  ;;  %v1958_v33 = vunpack.c.h.bf16 %v2194_v28  ;;  %v1957_v34 = vunpack.c.l.bf16 %v2194_v28 }
   0x9   :  { %437 = vadd.xlane.f32.xlu0 %v436_v21  ;;  %v493_v36 = vsel %vm435_vm0, %v326_v29, 0.0  ;;  %v1962_v37 = vunpack.c.h.bf16 %v2195_v35  ;;  %v490_v38 = vsel %vm435_vm0, %v325_v32, 0.0  ;;  %v1961_v41 = vunpack.c.l.bf16 %v2195_v35 }
   0xa   :  { %v340_v39 = vmul.f32 %v2358_v9, %v1958_v33  ;;  %v339_v40 = vmul.f32 %v2350_v4, %v1957_v34  ;;  %v1990_v43 = vunpack.c.h.bf16 %v2202_v42  ;;  %v1989_v44 = vunpack.c.l.bf16 %v2202_v42 }
   0xb   :  { %v342_v49 = vmul.f32 %v2360_v12, %v1962_v37  ;;  %v341_v50 = vmul.f32 %v2367_v17, %v1961_v41  ;;  %v1902_v53 = vunpack.c.h.bf16 %v2180_v45  ;;  %v2406_v54 = vunpack.c.h.bf16 %v2243_v46 }
   0xc   :  { %488 = vadd.xlane.f32.xlu1 %v487_v24  ;;  %v535_v47 = vsel %vm435_vm0, %v340_v39, 0.0  ;;  %v532_v48 = vsel %vm435_vm0, %v339_v40, 0.0  ;;  %v356_v51 = vmul.f32 %v2358_v9, %v1990_v43  ;;  %v355_v52 = vmul.f32 %v2350_v4, %v1989_v44 }
   0xd   :  { %440 = vadd.xlane.f32.xlu0 %v439_v25 }
  0x10   :  { %446 = vadd.xlane.f32.xlu1 %v445_v30 }
  0x11   :  { %443 = vadd.xlane.f32.xlu0 %v442_v31 }
  0x14   :  { %494 = vadd.xlane.f32.xlu1 %v493_v36 }
  0x15   :  { %491 = vadd.xlane.f32.xlu0 %v490_v38 }
  0x18   :  { %536 = vadd.xlane.f32.xlu1 %v535_v47 }
  0x19   :  { %533 = vadd.xlane.f32.xlu0 %v532_v48 }
  0x1a   :  { %9 = vsyncpa [#allocation3], 0  ;;  %v541_v55 = vsel %vm435_vm0, %v342_v49, 0.0  ;;  %v538_v56 = vsel %vm435_vm0, %v341_v50, 0.0  ;;  %v1901_v57 = vunpack.c.l.bf16 %v2180_v45  ;;  %v2410_v58 = vunpack.c.l.bf16 %v2243_v46  ;;  %v2188_v59 = vld [vmem:[%s3336_s0 + $0x50] sm:$0xff]   ;;  %v2203_v2 = vld [vmem:[%s3336_s0 + $0xc8] sm:$0xff]  }
  0x1b   :  { %v583_v60 = vsel %vm435_vm0, %v356_v51, 0.0  ;;  %v580_v61 = vsel %vm435_vm0, %v355_v52, 0.0  ;;  %v312_v62 = vmul.f32 %v2406_v54, %v1902_v53  ;;  %v1934_v0 = vunpack.c.h.bf16 %v2188_v59  ;;  %v2210_v11 = vld [vmem:[%s3336_s0 + $0x100] sm:$0xff]   ;;  %v2196_v20 = vld [vmem:[%s3336_s0 + $0x90] sm:$0xff]   ;;  %v2211_v27 = vld [vmem:[%s3336_s0 + $0x108] sm:$0xff]   ;;  %s2315_s17 = smov [#allocation2]  }
  0x1c   :  { %542 = vadd.xlane.f32.xlu1 %v541_v55  ;;  %v311_v63 = vmul.f32 %v2410_v58, %v1901_v57  ;;  %v1933_v1 = vunpack.c.l.bf16 %v2188_v59  ;;  %v1994_v3 = vunpack.c.h.bf16 %v2203_v2  ;;  %v1993_v5 = vunpack.c.l.bf16 %v2203_v2  ;;  %v2218_v34 = vld [vmem:[%s3336_s0 + $0x140] sm:$0xff]   ;;  %v2181_v41 = vld [vmem:[%s3336_s0 + $0x18] sm:$0xff]   ;;  %s1874_s18 = sshll.u32 %s2315_s17, 4  ;;  %s1875_s18 = int_to_ptr.vmem [resolvable:$true] %s1874_s18 }
  0x1d   :  { %539 = vadd.xlane.f32.xlu0 %v538_v56  ;;  %v451_v6 = vsel %vm435_vm0, %v312_v62, 0.0  ;;  %v328_v8 = vmul.f32 %v2406_v54, %v1934_v0  ;;  %v2022_v13 = vunpack.c.h.bf16 %v2210_v11  ;;  %v2021_v14 = vunpack.c.l.bf16 %v2210_v11  ;;  %v2244_v42 = vld [vmem:[%s3337_s1 + $0x18] sm:$0xff]   ;;  %s2289_s19 = scalar_lea.vmem %s1875_s18, 128  ;;  %p2294_p1 = scmp.lt.s32.totalorder %s1875_s18, %s1875_s18 }
  0x1e   :  { %v448_v7 = vsel %vm435_vm0, %v311_v63, 0.0  ;;  %v327_v10 = vmul.f32 %v2410_v58, %v1933_v1  ;;  %v358_v18 = vmul.f32 %v2360_v12, %v1994_v3  ;;  %v357_v19 = vmul.f32 %v2367_v17, %v1993_v5  ;;  %v2189_v51 = vld [vmem:[%s3336_s0 + $0x58] sm:$0xff]   ;;  %v2219_v3 = vld [vmem:[%s3336_s0 + $0x148] sm:$0xff]   ;;  %p2290_p0 = scmp.ne.s32.totalorder %s1875_s18, %s2289_s19  ;;  %p2295_p2 = scmp.lt.s32.totalorder %s2289_s19, %s2289_s19 }
  0x1f   :  { %v499_v15 = vsel %vm435_vm0, %v328_v8, 0.0  ;;  %v372_v21 = vmul.f32 %v2358_v9, %v2022_v13  ;;  %v371_v22 = vmul.f32 %v2350_v4, %v2021_v14  ;;  %v1966_v25 = vunpack.c.h.bf16 %v2196_v20  ;;  %v2226_v13 = vld [vmem:[%s3336_s0 + $0x180] sm:$0xff]  }
  0x20   :  { %584 = vadd.xlane.f32.xlu1 %v583_v60  ;;  %v496_v16 = vsel %vm435_vm0, %v327_v10, 0.0  ;;  %v589_v23 = vsel %vm435_vm0, %v358_v18, 0.0  ;;  %v586_v24 = vsel %vm435_vm0, %v357_v19, 0.0  ;;  %v1965_v26 = vunpack.c.l.bf16 %v2196_v20  ;;  %v2204_v60 = vld [vmem:[%s3336_s0 + $0xd0] sm:$0xff]   ;;  %p2296_p3 = por %p2295_p2, %p2294_p1 }
  0x21   :  { %581 = vadd.xlane.f32.xlu0 %v580_v61  ;;  %v631_v28 = vsel %vm435_vm0, %v372_v21, 0.0  ;;  %v628_v29 = vsel %vm435_vm0, %v371_v22, 0.0  ;;  %v344_v30 = vmul.f32 %v2406_v54, %v1966_v25  ;;  %v2026_v32 = vunpack.c.h.bf16 %v2211_v27  ;;  %v2197_v21 = vld [vmem:[%s3336_s0 + $0x98] sm:$0xff]  }
  0x22   :  { %v343_v31 = vmul.f32 %v2410_v58, %v1965_v26  ;;  %v2025_v33 = vunpack.c.l.bf16 %v2211_v27  ;;  %v2054_v35 = vunpack.c.h.bf16 %v2218_v34  ;;  %v2053_v36 = vunpack.c.l.bf16 %v2218_v34  ;;  %p2297_p4 = pnand %p2296_p3, %p2290_p0 }
  0x23   :  { %v547_v37 = vsel %vm435_vm0, %v344_v30, 0.0  ;;  %v374_v39 = vmul.f32 %v2360_v12, %v2026_v32  ;;  %v1906_v45 = vunpack.c.h.bf16 %v2181_v41  ;;  %v2462_v46 = vunpack.c.h.bf16 %v2244_v42 }
  0x24   :  { %452 = vadd.xlane.f32.xlu1 %v451_v6  ;;  %v544_v38 = vsel %vm435_vm0, %v343_v31, 0.0  ;;  %v373_v40 = vmul.f32 %v2367_v17, %v2025_v33  ;;  %v388_v43 = vmul.f32 %v2358_v9, %v2054_v35  ;;  %v387_v44 = vmul.f32 %v2350_v4, %v2053_v36  ;;  %v2227_v35 = vld [vmem:[%s3336_s0 + $0x188] sm:$0xff]  }
  0x25   :  { %449 = vadd.xlane.f32.xlu0 %v448_v7  ;;  %v637_v47 = vsel %vm435_vm0, %v374_v39, 0.0  ;;  %v1905_v49 = vunpack.c.l.bf16 %v2181_v41  ;;  %v2466_v50 = vunpack.c.l.bf16 %v2244_v42  ;;  %v314_v53 = vmul.f32 %v2462_v46, %v1906_v45  ;;  %v2234_v42 = vld [vmem:[%s3336_s0 + $0x1c0] sm:$0xff]  }
  0x26   :  { %v634_v48 = vsel %vm435_vm0, %v373_v40, 0.0  ;;  %v679_v52 = vsel %vm435_vm0, %v388_v43, 0.0  ;;  %v676_v55 = vsel %vm435_vm0, %v387_v44, 0.0  ;;  %v1938_v57 = vunpack.c.h.bf16 %v2189_v51 }
  0x27   :  { %v313_v56 = vmul.f32 %v2466_v50, %v1905_v49  ;;  %v1937_v59 = vunpack.c.l.bf16 %v2189_v51  ;;  %v457_v61 = vsel %vm435_vm0, %v314_v53, 0.0  ;;  %v1998_v62 = vunpack.c.h.bf16 %v2204_v60  ;;  %v2182_v51 = vld [vmem:[%s3336_s0 + $0x20] sm:$0xff]  }
  0x28   :  { %500 = vadd.xlane.f32.xlu1 %v499_v15  ;;  %v330_v0 = vmul.f32 %v2462_v46, %v1938_v57  ;;  %v1997_v2 = vunpack.c.l.bf16 %v2204_v60  ;;  %v2058_v5 = vunpack.c.h.bf16 %v2219_v3  ;;  %v2057_v6 = vunpack.c.l.bf16 %v2219_v3 }
  0x29   :  { %497 = vadd.xlane.f32.xlu0 %v496_v16  ;;  %v454_v63 = vsel %vm435_vm0, %v313_v56, 0.0  ;;  %v329_v1 = vmul.f32 %v2466_v50, %v1937_v59  ;;  %v360_v10 = vmul.f32 %v2406_v54, %v1998_v62  ;;  %v2086_v15 = vunpack.c.h.bf16 %v2226_v13 }
  0x2a   :  { %v505_v7 = vsel %vm435_vm0, %v330_v0, 0.0  ;;  %v359_v11 = vmul.f32 %v2410_v58, %v1997_v2  ;;  %v390_v14 = vmul.f32 %v2360_v12, %v2058_v5  ;;  %v389_v19 = vmul.f32 %v2367_v17, %v2057_v6  ;;  %v2205_v5 = vld [vmem:[%s3336_s0 + $0xd8] sm:$0xff]  }
  0x2b   :  { %v502_v8 = vsel %vm435_vm0, %v329_v1, 0.0  ;;  %v595_v16 = vsel %vm435_vm0, %v360_v10, 0.0  ;;  %v2085_v20 = vunpack.c.l.bf16 %v2226_v13  ;;  %v1970_v26 = vunpack.c.h.bf16 %v2197_v21 }
  0x2c   :  { %590 = vadd.xlane.f32.xlu1 %v589_v23  ;;  %v592_v18 = vsel %vm435_vm0, %v359_v11, 0.0  ;;  %v685_v22 = vsel %vm435_vm0, %v390_v14, 0.0  ;;  %v404_v23 = vmul.f32 %v2358_v9, %v2086_v15  ;;  %v1969_v27 = vunpack.c.l.bf16 %v2197_v21  ;;  %v2220_v14 = vld [vmem:[%s3336_s0 + $0x150] sm:$0xff]  }
  0x2d   :  { %587 = vadd.xlane.f32.xlu0 %v586_v24  ;;  %v682_v24 = vsel %vm435_vm0, %v389_v19, 0.0  ;;  %v403_v25 = vmul.f32 %v2350_v4, %v2085_v20  ;;  %v346_v32 = vmul.f32 %v2462_v46, %v1970_v26  ;;  %v2090_v36 = vunpack.c.h.bf16 %v2227_v35 }
  0x2e   :  { %v345_v33 = vmul.f32 %v2466_v50, %v1969_v27  ;;  %v2118_v45 = vunpack.c.h.bf16 %v2234_v42  ;;  %v2117_v49 = vunpack.c.l.bf16 %v2234_v42  ;;  %v1910_v57 = vunpack.c.h.bf16 %v2182_v51 }
  0x2f   :  { %v724_v31 = vsel %vm435_vm0, %v403_v25, 0.0  ;;  %v406_v43 = vmul.f32 %v2360_v12, %v2090_v36  ;;  %v2002_v6 = vunpack.c.h.bf16 %v2205_v5  ;;  %v2061_v21 = vunpack.c.l.bf16 %v2220_v14  ;;  %v2213_v36 = vld [vmem:[%s3336_s0 + $0x118] sm:$0xff]  }
  0x30   :  { %632 = vadd.xlane.f32.xlu1 %v631_v28  ;;  %v2212_v28 = vld [vmem:[%s3336_s0 + $0x110] sm:$0xff]   ;;  %v550_v39 = vsel %vm435_vm0, %v345_v33, 0.0  ;;  %v420_v56 = vmul.f32 %v2358_v9, %v2118_v45  ;;  %v419_v59 = vmul.f32 %v2350_v4, %v2117_v49  ;;  %v2183_v49 = vld [vmem:[%s3336_s0 + $0x28] sm:$0xff]   ;;  %vm1110_vm1 = vcmask 130112  }
  0x31   :  { %629 = vadd.xlane.f32.xlu0 %v628_v29  ;;  %v727_v29 = vsel %vm435_vm0, %v404_v23, 0.0  ;;  %v2030_v30 = vunpack.c.h.bf16 %v2212_v28  ;;  %v2029_v34 = vunpack.c.l.bf16 %v2212_v28  ;;  %v733_v53 = vsel %vm435_vm0, %v406_v43, 0.0 }
  0x32   :  { %v775_v0 = vsel %vm435_vm0, %v420_v56, 0.0  ;;  %v772_v2 = vsel %vm435_vm0, %v419_v59, 0.0  ;;  %v362_v15 = vmul.f32 %v2462_v46, %v2002_v6  ;;  %v391_v26 = vmul.f32 %v2410_v58, %v2061_v21  ;;  %v2206_v6 = vld [vmem:[%s3336_s0 + $0xe0] sm:$0xff]  }
  0x33   :  { %v376_v40 = vmul.f32 %v2406_v54, %v2030_v30  ;;  %v375_v41 = vmul.f32 %v2410_v58, %v2029_v34  ;;  %vm1117_vm2 = vcmask 195712   ;;  %vm1124_vm3 = vcmask 261312  }
  0x34   :  { %548 = vadd.xlane.f32.xlu1 %v547_v37  ;;  %v2089_v37 = vunpack.c.l.bf16 %v2227_v35  ;;  %v601_v23 = vsel %vm435_vm0, %v362_v15, 0.0  ;;  %v2221_v15 = vld [vmem:[%s3336_s0 + $0x158] sm:$0xff]   ;;  %vm1131_vm4 = vcmask 326912   ;;  %vm1138_vm5 = vcmask 392512  }
  0x35   :  { %545 = vadd.xlane.f32.xlu0 %v544_v38  ;;  %v553_v38 = vsel %vm435_vm0, %v346_v32, 0.0  ;;  %v688_v32 = vsel %vm435_vm0, %v391_v26, 0.0  ;;  %vm1145_vm6 = vcmask 458112   ;;  %vm1152_vm7 = vcmask 523712  }
  0x36   :  { %v405_v44 = vmul.f32 %v2367_v17, %v2089_v37  ;;  %v2034_v37 = vunpack.c.h.bf16 %v2213_v36  ;;  %vm1159_vm8 = vcmask 589312   ;;  %vm1166_vm9 = vcmask 654912  }
  0x37   :  { %vm1173_vm10 = vcmask 720512   ;;  %vm1180_vm11 = vcmask 786112   ;;  %vm2314_vm12 = vmmov 0   ;;  %vm1187_vm13 = vcmask 851712  }
  0x38   :  { %638 = vadd.xlane.f32.xlu1 %v637_v47  ;;  %v643_v47 = vsel %vm435_vm0, %v376_v40, 0.0  ;;  %vm1194_vm14 = vcmask 917312   ;;  %vm1201_vm15 = vcmask 982912  }
  0x39   :  { %635 = vadd.xlane.f32.xlu0 %v634_v48  ;;  %v640_v48 = vsel %vm435_vm0, %v375_v41, 0.0 }
  0x3c   :  { %680 = vadd.xlane.f32.xlu1 %v679_v52  ;;  %v2245_v52 = vld [vmem:[%s3337_s1 + $0x20] sm:$0xff]  }
  0x3d   :  { %677 = vadd.xlane.f32.xlu0 %v676_v55  ;;  %v730_v55 = vsel %vm435_vm0, %v405_v44, 0.0  ;;  %v2534_v60 = vunpack.c.h.bf16 %v2245_v52  ;;  %v2536_v62 = vunpack.c.l.bf16 %v2245_v52 }
  0x3f   :  { %v316_v9 = vmul.f32 %v2534_v60, %v1910_v57  ;;  %v1914_v57 = vunpack.c.h.bf16 %v2183_v49 }
  0x40   :  { %458 = vadd.xlane.f32.xlu1 %v457_v61  ;;  %v1909_v61 = vunpack.c.l.bf16 %v2182_v51  ;;  %v2246_v51 = vld [vmem:[%s3337_s1 + $0x28] sm:$0xff]  }
  0x41   :  { %455 = vadd.xlane.f32.xlu0 %v454_v63  ;;  %v2190_v63 = vld [vmem:[%s3336_s0 + $0x60] sm:$0xff]   ;;  %v2597_v59 = vunpack.c.h.bf16 %v2246_v51 }
  0x42   :  { %v1942_v1 = vunpack.c.h.bf16 %v2190_v63  ;;  %v315_v4 = vmul.f32 %v2536_v62, %v1909_v61  ;;  %v1941_v3 = vunpack.c.l.bf16 %v2190_v63  ;;  %v1913_v61 = vunpack.c.l.bf16 %v2183_v49 }
  0x43   :  { %v2599_v63 = vunpack.c.l.bf16 %v2246_v51 }
  0x44   :  { %506 = vadd.xlane.f32.xlu1 %v505_v7  ;;  %v2001_v7 = vunpack.c.l.bf16 %v2205_v5  ;;  %v460_v10 = vsel %vm435_vm0, %v315_v4, 0.0  ;;  %v332_v11 = vmul.f32 %v2534_v60, %v1942_v1  ;;  %v331_v13 = vmul.f32 %v2536_v62, %v1941_v3 }
  0x45   :  { %503 = vadd.xlane.f32.xlu0 %v502_v8  ;;  %v463_v8 = vsel %vm435_vm0, %v316_v9, 0.0  ;;  %v318_v9 = vmul.f32 %v2597_v59, %v1914_v57  ;;  %v317_v4 = vmul.f32 %v2599_v63, %v1913_v61 }
  0x46   :  { %v508_v19 = vsel %vm435_vm0, %v331_v13, 0.0  ;;  %v361_v20 = vmul.f32 %v2466_v50, %v2001_v7  ;;  %v2006_v7 = vunpack.c.h.bf16 %v2206_v6 }
  0x48   :  { %596 = vadd.xlane.f32.xlu1 %v595_v16  ;;  %v2062_v16 = vunpack.c.h.bf16 %v2220_v14  ;;  %v598_v25 = vsel %vm435_vm0, %v361_v20, 0.0  ;;  %v364_v21 = vmul.f32 %v2534_v60, %v2006_v7 }
  0x49   :  { %593 = vadd.xlane.f32.xlu0 %v592_v18  ;;  %v511_v18 = vsel %vm435_vm0, %v332_v11, 0.0  ;;  %v466_v11 = vsel %vm435_vm0, %v317_v4, 0.0 }
  0x4a   :  { %v607_v26 = vsel %vm435_vm0, %v364_v21, 0.0 }
  0x4c   :  { %686 = vadd.xlane.f32.xlu1 %v685_v22  ;;  %v2235_v22 = vld [vmem:[%s3336_s0 + $0x1c8] sm:$0xff]  }
  0x4d   :  { %683 = vadd.xlane.f32.xlu0 %v682_v24  ;;  %v392_v24 = vmul.f32 %v2406_v54, %v2062_v16  ;;  %v2122_v27 = vunpack.c.h.bf16 %v2235_v22  ;;  %v2121_v28 = vunpack.c.l.bf16 %v2235_v22  ;;  %v2066_v16 = vunpack.c.h.bf16 %v2221_v15 }
  0x4f   :  { %v691_v30 = vsel %vm435_vm0, %v392_v24, 0.0  ;;  %v422_v33 = vmul.f32 %v2360_v12, %v2122_v27  ;;  %v421_v34 = vmul.f32 %v2367_v17, %v2121_v28  ;;  %v2228_v12 = vld [vmem:[%s3336_s0 + $0x190] sm:$0xff]   ;;  %v378_v17 = vmul.f32 %v2462_v46, %v2034_v37  ;;  %v2214_v37 = vld [vmem:[%s3336_s0 + $0x120] sm:$0xff]  }
  0x50   :  { %728 = vadd.xlane.f32.xlu1 %v727_v29  ;;  %v2198_v29 = vld [vmem:[%s3336_s0 + $0xa0] sm:$0xff]   ;;  %v2094_v44 = vunpack.c.h.bf16 %v2228_v12  ;;  %v2093_v45 = vunpack.c.l.bf16 %v2228_v12  ;;  %v394_v24 = vmul.f32 %v2462_v46, %v2066_v16 }
  0x51   :  { %725 = vadd.xlane.f32.xlu0 %v724_v31  ;;  %v1974_v31 = vunpack.c.h.bf16 %v2198_v29  ;;  %v1973_v35 = vunpack.c.l.bf16 %v2198_v29  ;;  %v778_v40 = vsel %vm435_vm0, %v421_v34, 0.0  ;;  %v649_v52 = vsel %vm435_vm0, %v378_v17, 0.0 }
  0x52   :  { %v407_v56 = vmul.f32 %v2410_v58, %v2093_v45 }
  0x53   :  { %v348_v41 = vmul.f32 %v2534_v60, %v1974_v31  ;;  %v347_v42 = vmul.f32 %v2536_v62, %v1973_v35  ;;  %v697_v31 = vsel %vm435_vm0, %v394_v24, 0.0 }
  0x54   :  { %554 = vadd.xlane.f32.xlu1 %v553_v38  ;;  %v2033_v38 = vunpack.c.l.bf16 %v2213_v36 }
  0x55   :  { %551 = vadd.xlane.f32.xlu0 %v550_v39  ;;  %v781_v39 = vsel %vm435_vm0, %v422_v33, 0.0 }
  0x56   :  { %v377_v43 = vmul.f32 %v2466_v50, %v2033_v38  ;;  %v1099_v38 = vlaneseq }
  0x58   :  { %644 = vadd.xlane.f32.xlu1 %v643_v47  ;;  %v559_v47 = vsel %vm435_vm0, %v348_v41, 0.0  ;;  %v2646_v17 = vand.u32 127, %v1099_v38 }
  0x59   :  { %641 = vadd.xlane.f32.xlu0 %v640_v48  ;;  %v556_v48 = vsel %vm435_vm0, %v347_v42, 0.0 }
  0x5a   :  { %v1105_v57 = vadd.s32 4294967288, %v2646_v17 }
  0x5c   :  { %734 = vadd.xlane.f32.xlu1 %v733_v53  ;;  %v646_v53 = vsel %vm435_vm0, %v377_v43, 0.0 }
  0x5d   :  { %731 = vadd.xlane.f32.xlu0 %v730_v55  ;;  %v408_v55 = vmul.f32 %v2406_v54, %v2094_v44 }
  0x5f   :  { %v739_v1 = vsel %vm435_vm0, %v408_v55, 0.0  ;;  %v2247_v55 = vld [vmem:[%s3337_s1 + $0x30] sm:$0xff]  }
  0x60   :  { %776 = vadd.xlane.f32.xlu1 %v775_v0  ;;  %v2191_v0 = vld [vmem:[%s3336_s0 + $0x68] sm:$0xff]   ;;  %v2667_v7 = vunpack.c.l.bf16 %v2247_v55 }
  0x61   :  { %773 = vadd.xlane.f32.xlu0 %v772_v2  ;;  %v736_v2 = vsel %vm435_vm0, %v407_v56, 0.0  ;;  %v1946_v3 = vunpack.c.h.bf16 %v2191_v0  ;;  %v1945_v5 = vunpack.c.l.bf16 %v2191_v0  ;;  %v2658_v56 = vshrl.u32 %v1099_v38, 7 }
  0x63   :  { %v334_v13 = vmul.f32 %v2597_v59, %v1946_v3  ;;  %v333_v14 = vmul.f32 %v2599_v63, %v1945_v5  ;;  %v2679_v16 = vsub.s32 %v1105_v57, %v2658_v56 }
  0x64   :  { %464 = vadd.xlane.f32.xlu1 %v463_v8  ;;  %v2005_v8 = vunpack.c.l.bf16 %v2206_v6 }
  0x65   :  { %461 = vadd.xlane.f32.xlu0 %v460_v10  ;;  %v469_v10 = vsel %vm435_vm0, %v318_v9, 0.0  ;;  %v514_v20 = vsel %vm435_vm0, %v333_v14, 0.0  ;;  %v1119_v14 = vadd.s32 4294967272, %v2646_v17 }
  0x66   :  { %v363_v22 = vmul.f32 %v2536_v62, %v2005_v8  ;;  %v2192_v8 = vld [vmem:[%s3336_s0 + $0x70] sm:$0xff]  }
  0x68   :  { %512 = vadd.xlane.f32.xlu1 %v511_v18  ;;  %v2065_v18 = vunpack.c.l.bf16 %v2221_v15  ;;  %v604_v27 = vsel %vm435_vm0, %v363_v22, 0.0  ;;  %v2676_v15 = vsub.s32 %v2646_v17, %v2658_v56  ;;  %v1950_v22 = vunpack.c.h.bf16 %v2192_v8 }
  0x69   :  { %509 = vadd.xlane.f32.xlu0 %v508_v19  ;;  %v517_v19 = vsel %vm435_vm0, %v334_v13, 0.0  ;;  %v1112_v13 = vadd.s32 4294967280, %v2646_v17 }
  0x6c   :  { %602 = vadd.xlane.f32.xlu1 %v601_v23  ;;  %v2236_v23 = vld [vmem:[%s3336_s0 + $0x1d0] sm:$0xff]  }
  0x6d   :  { %599 = vadd.xlane.f32.xlu0 %v598_v25  ;;  %v393_v25 = vmul.f32 %v2466_v50, %v2065_v18  ;;  %v2126_v28 = vunpack.c.h.bf16 %v2236_v23  ;;  %v2125_v29 = vunpack.c.l.bf16 %v2236_v23  ;;  %v2207_v18 = vld [vmem:[%s3336_s0 + $0xe8] sm:$0xff]  }
  0x6f   :  { %v424_v33 = vmul.f32 %v2406_v54, %v2126_v28  ;;  %v423_v34 = vmul.f32 %v2410_v58, %v2125_v29  ;;  %v2229_v58 = vld [vmem:[%s3336_s0 + $0x198] sm:$0xff]   ;;  %v1949_v28 = vunpack.c.l.bf16 %v2192_v8  ;;  %v2689_v29 = vsub.s32 %v1112_v13, %v2658_v56 }
  0x70   :  { %692 = vadd.xlane.f32.xlu1 %v691_v30  ;;  %v2199_v30 = vld [vmem:[%s3336_s0 + $0xa8] sm:$0xff]   ;;  %v2098_v51 = vunpack.c.h.bf16 %v2229_v58  ;;  %v2237_v13 = vld [vmem:[%s3336_s0 + $0x1d8] sm:$0xff]  }
  0x71   :  { %689 = vadd.xlane.f32.xlu0 %v688_v32  ;;  %v694_v32 = vsel %vm435_vm0, %v393_v25, 0.0  ;;  %v1978_v35 = vunpack.c.h.bf16 %v2199_v30  ;;  %v1977_v36 = vunpack.c.l.bf16 %v2199_v30  ;;  %v787_v41 = vsel %vm435_vm0, %v424_v33, 0.0 }
  0x72   :  { %v784_v42 = vsel %vm435_vm0, %v423_v34, 0.0  ;;  %v410_v3 = vmul.f32 %v2462_v46, %v2098_v51  ;;  %v2692_v30 = vsub.s32 %v1119_v14, %v2658_v56 }
  0x73   :  { %v350_v12 = vmul.f32 %v2597_v59, %v1978_v35  ;;  %v349_v54 = vmul.f32 %v2599_v63, %v1977_v36  ;;  %v2009_v35 = vunpack.c.l.bf16 %v2207_v18  ;;  %v2222_v36 = vld [vmem:[%s3336_s0 + $0x160] sm:$0xff]  }
  0x74   :  { %782 = vadd.xlane.f32.xlu1 %v781_v39  ;;  %v2038_v39 = vunpack.c.h.bf16 %v2214_v37  ;;  %v745_v25 = vsel %vm435_vm0, %v410_v3, 0.0 }
  0x75   :  { %779 = vadd.xlane.f32.xlu0 %v778_v40  ;;  %v2037_v40 = vunpack.c.l.bf16 %v2214_v37  ;;  %v562_v49 = vsel %vm435_vm0, %v349_v54, 0.0 }
  0x76   :  { %v380_v43 = vmul.f32 %v2534_v60, %v2038_v39 }
  0x77   :  { %v379_v44 = vmul.f32 %v2536_v62, %v2037_v40 }
  0x78   :  { %560 = vadd.xlane.f32.xlu1 %v559_v47  ;;  %v655_v61 = vsel %vm435_vm0, %v380_v43, 0.0  ;;  %v335_v43 = vmul.f32 %v2667_v7, %v1949_v28  ;;  %v2130_v28 = vunpack.c.h.bf16 %v2237_v13 }
  0x79   :  { %557 = vadd.xlane.f32.xlu0 %v556_v48  ;;  %v565_v48 = vsel %vm435_vm0, %v350_v12, 0.0  ;;  %v652_v0 = vsel %vm435_vm0, %v379_v44, 0.0 }
  0x7a   :  { %v520_v3 = vsel %vm435_vm0, %v335_v43, 0.0  ;;  %v426_v43 = vmul.f32 %v2462_v46, %v2130_v28 }
  0x7c   :  { %650 = vadd.xlane.f32.xlu1 %v649_v52  ;;  %v2097_v52 = vunpack.c.l.bf16 %v2229_v58 }
  0x7d   :  { %647 = vadd.xlane.f32.xlu0 %v646_v53  ;;  %v2184_v53 = vld [vmem:[%s3336_s0 + $0x30] sm:$0xff]  }
  0x7e   :  { %v409_v5 = vmul.f32 %v2466_v50, %v2097_v52  ;;  %v1917_v6 = vunpack.c.l.bf16 %v2184_v53 }
  0x80   :  { %740 = vadd.xlane.f32.xlu1 %v739_v1  ;;  %v1918_v1 = vunpack.c.h.bf16 %v2184_v53 }
  0x81   :  { %737 = vadd.xlane.f32.xlu0 %v736_v2  ;;  %v2663_v2 = vunpack.c.h.bf16 %v2247_v55 }
  0x83   :  { %v320_v21 = vmul.f32 %v2663_v2, %v1918_v1  ;;  %v336_v40 = vmul.f32 %v2663_v2, %v1950_v22 }
  0x84   :  { %470 = vadd.xlane.f32.xlu1 %v469_v10 }
  0x85   :  { %467 = vadd.xlane.f32.xlu0 %v466_v11  ;;  %v475_v39 = vsel %vm435_vm0, %v320_v21, 0.0 }
  0x88   :  { %518 = vadd.xlane.f32.xlu1 %v517_v19 }
  0x89   :  { %515 = vadd.xlane.f32.xlu0 %v514_v20 }
  0x8c   :  { %608 = vadd.xlane.f32.xlu1 %v607_v26  ;;  %v742_v26 = vsel %vm435_vm0, %v409_v5, 0.0  ;;  %v2069_v5 = vunpack.c.l.bf16 %v2222_v36 }
  0x8d   :  { %605 = vadd.xlane.f32.xlu0 %v604_v27  ;;  %v319_v27 = vmul.f32 %v2667_v7, %v1917_v6 }
  0x8f   :  { %v472_v58 = vsel %vm435_vm0, %v319_v27, 0.0  ;;  %v395_v27 = vmul.f32 %v2536_v62, %v2069_v5 }
  0x90   :  { %698 = vadd.xlane.f32.xlu1 %v697_v31  ;;  %v2010_v31 = vunpack.c.h.bf16 %v2207_v18 }
  0x91   :  { %695 = vadd.xlane.f32.xlu0 %v694_v32 }
  0x94   :  { %788 = vadd.xlane.f32.xlu1 %v787_v41 }
  0x95   :  { %785 = vadd.xlane.f32.xlu0 %v784_v42  ;;  %v486_v45 = vpop.xlane.xlu1 %485 }
  0x96   :  { %v438_v47 = vpop.xlane.xlu0 %437 }
  0x98   :  { %566 = vadd.xlane.f32.xlu1 %v565_v48 }
  0x99   :  { %563 = vadd.xlane.f32.xlu0 %v562_v49  ;;  %v489_v9 = vpop.xlane.xlu1 %488 }
  0x9a   :  { %v441_v4 = vpop.xlane.xlu0 %440  ;;  %v828_v10 = vpack.c.bf16 %v489_v9, %v486_v45  ;;  %v366_v45 = vmul.f32 %v2597_v59, %v2010_v31  ;;  %v2129_v31 = vunpack.c.l.bf16 %v2237_v13 }
  0x9b   :  { %v820_v11 = vpack.c.bf16 %v441_v4, %v438_v47  ;;  %v2070_v47 = vunpack.c.h.bf16 %v2222_v36  ;;  %v523_v4 = vsel %vm435_vm0, %v336_v40, 0.0 }
  0x9c   :  { %656 = vadd.xlane.f32.xlu1 %v655_v61  ;;  %v987_v32 = vunpack.c.l.b16 %v828_v10  ;;  %v988_v33 = vunpack.c.h.b16 %v828_v10  ;;  %v365_v61 = vmul.f32 %v2599_v63, %v2009_v35  ;;  %v613_v18 = vsel %vm435_vm0, %v366_v45, 0.0 }
  0x9d   :  { %v971_v19 = vunpack.c.l.b16 %v820_v11  ;;  %v972_v20 = vunpack.c.h.b16 %v820_v11  ;;  %653 = vadd.xlane.f32.xlu0 %v652_v0  ;;  %v447_v23 = vpop.xlane.xlu1 %446 }
  0x9e   :  { %v444_v24 = vpop.xlane.xlu0 %443  ;;  %v1213_v48 = vrot.slane %v987_v32, %v2676_v15  ;;  %v1217_v49 = vrot.slane %v988_v33, %v2679_v16  ;;  %v2200_v32 = vld [vmem:[%s3336_s0 + $0xb0] sm:$0xff]  }
  0x9f   :  { %v821_v34 = vpack.c.bf16 %v447_v23, %v444_v24  ;;  %v1104_v37 = vrot.slane %v971_v19, %v2676_v15  ;;  %v1109_v38 = vrot.slane %v972_v20, %v2679_v16  ;;  %v396_v19 = vmul.f32 %v2534_v60, %v2070_v47 }
  0xa0   :  { %746 = vadd.xlane.f32.xlu1 %v745_v25  ;;  %v1218_v14 = vsel %vm1110_vm1, %v1217_v49, %v1213_v48  ;;  %v610_v23 = vsel %vm435_vm0, %v365_v61, 0.0 }
  0xa1   :  { %743 = vadd.xlane.f32.xlu0 %v742_v26  ;;  %v973_v41 = vunpack.c.l.b16 %v821_v34  ;;  %v974_v42 = vunpack.c.h.b16 %v821_v34  ;;  %v495_v12 = vpop.xlane.xlu1 %494  ;;  %v1111_v53 = vsel %vm1110_vm1, %v1109_v38, %v1104_v37  ;;  %v2215_v34 = vld [vmem:[%s3336_s0 + $0x128] sm:$0xff]   ;;  %v703_v37 = vsel %vm435_vm0, %v396_v19, 0.0 }
  0xa2   :  { %v492_v54 = vpop.xlane.xlu0 %491  ;;  %v1126_v38 = vadd.s32 4294967264, %v2646_v17  ;;  %v2042_v45 = vunpack.c.h.bf16 %v2215_v34 }
  0xa3   :  { %v829_v44 = vpack.c.bf16 %v495_v12, %v492_v54  ;;  %v1116_v51 = vrot.slane %v973_v41, %v2689_v29  ;;  %v1123_v52 = vrot.slane %v974_v42, %v2692_v30  ;;  %v1982_v41 = vunpack.c.h.bf16 %v2200_v32 }
  0xa4   :  { %476 = vadd.xlane.f32.xlu1 %v475_v39  ;;  %v1981_v42 = vunpack.c.l.bf16 %v2200_v32  ;;  %v2760_v5 = vsub.s32 %v1126_v38, %v2658_v56 }
  0xa5   :  { %v989_v55 = vunpack.c.l.b16 %v829_v44  ;;  %v990_v57 = vunpack.c.h.b16 %v829_v44  ;;  %473 = vadd.xlane.f32.xlu0 %v472_v58  ;;  %v1118_v0 = vsel %vm1117_vm2, %v1116_v51, %v1111_v53  ;;  %v537_v1 = vpop.xlane.xlu1 %536  ;;  %v700_v58 = vsel %vm435_vm0, %v395_v27, 0.0 }
  0xa6   :  { %v534_v9 = vpop.xlane.xlu0 %533  ;;  %v2714_v6 = vsel %vm1124_vm3, %v1123_v52, %v1118_v0  ;;  %v425_v44 = vmul.f32 %v2466_v50, %v2129_v31  ;;  %v1133_v51 = vadd.s32 4294967256, %v2646_v17  ;;  %v2041_v53 = vunpack.c.l.bf16 %v2215_v34 }
  0xa7   :  { %v1222_v8 = vrot.slane %v989_v55, %v2689_v29  ;;  %v1227_v10 = vrot.slane %v990_v57, %v2692_v30  ;;  %v836_v11 = vpack.c.bf16 %v537_v1, %v534_v9  ;;  %v2230_v55 = vld [vmem:[%s3336_s0 + $0x1a0] sm:$0xff]   ;;  %v352_v46 = vmul.f32 %v2663_v2, %v1982_v41 }
  0xa8   :  { %524 = vadd.xlane.f32.xlu1 %v523_v4  ;;  %v351_v50 = vmul.f32 %v2667_v7, %v1981_v42  ;;  %v793_v9 = vsel %vm435_vm0, %v426_v43, 0.0  ;;  %v790_v4 = vsel %vm435_vm0, %v425_v44, 0.0  ;;  %v381_v13 = vmul.f32 %v2599_v63, %v2041_v53 }
  0xa9   :  { %v1223_v20 = vsel %vm1117_vm2, %v1222_v8, %v1218_v14  ;;  %v1003_v21 = vunpack.c.l.b16 %v836_v11  ;;  %v1004_v22 = vunpack.c.h.b16 %v836_v11  ;;  %521 = vadd.xlane.f32.xlu0 %v520_v3  ;;  %v543_v25 = vpop.xlane.xlu1 %542  ;;  %v382_v3 = vmul.f32 %v2597_v59, %v2042_v45  ;;  %v2193_v45 = vld [vmem:[%s3336_s0 + $0x78] sm:$0xff]  }
  0xaa   :  { %v2727_v24 = vsel %vm1124_vm3, %v1227_v10, %v1223_v20  ;;  %v540_v26 = vpop.xlane.xlu0 %539  ;;  %v2763_v8 = vsub.s32 %v1133_v51, %v2658_v56  ;;  %v2102_v11 = vunpack.c.h.bf16 %v2230_v55  ;;  %v2101_v14 = vunpack.c.l.bf16 %v2230_v55 }
  0xab   :  { %v837_v33 = vpack.c.bf16 %v543_v25, %v540_v26  ;;  %v1292_v35 = vrot.slane %v1003_v21, %v2676_v15  ;;  %v1296_v36 = vrot.slane %v1004_v22, %v2679_v16  ;;  %v571_v22 = vsel %vm435_vm0, %v352_v46, 0.0  ;;  %v2185_v26 = vld [vmem:[%s3336_s0 + $0x38] sm:$0xff]  }
  0xac   :  { %614 = vadd.xlane.f32.xlu1 %v613_v18  ;;  %v661_v25 = vsel %vm435_vm0, %v382_v3, 0.0  ;;  %v412_v32 = vmul.f32 %v2534_v60, %v2102_v11  ;;  %v1922_v41 = vunpack.c.h.bf16 %v2185_v26  ;;  %v1921_v43 = vunpack.c.l.bf16 %v2185_v26 }
  0xad   :  { %v1005_v39 = vunpack.c.l.b16 %v837_v33  ;;  %v1006_v40 = vunpack.c.h.b16 %v837_v33  ;;  %611 = vadd.xlane.f32.xlu0 %v610_v23  ;;  %v585_v12 = vpop.xlane.xlu1 %584  ;;  %v1297_v52 = vsel %vm1110_vm1, %v1296_v36, %v1292_v35  ;;  %v568_v23 = vsel %vm435_vm0, %v351_v50, 0.0  ;;  %v2248_v33 = vld [vmem:[%s3337_s1 + $0x38] sm:$0xff]  }
  0xae   :  { %v582_v54 = vpop.xlane.xlu0 %581  ;;  %v658_v36 = vsel %vm435_vm0, %v381_v13, 0.0  ;;  %v2787_v44 = vunpack.c.l.bf16 %v2248_v33  ;;  %v1954_v50 = vunpack.c.h.bf16 %v2193_v45  ;;  %v1953_v11 = vunpack.c.l.bf16 %v2193_v45 }
  0xaf   :  { %v1301_v47 = vrot.slane %v1005_v39, %v2689_v29  ;;  %v1306_v48 = vrot.slane %v1006_v40, %v2692_v30  ;;  %v844_v49 = vpack.c.bf16 %v585_v12, %v582_v54 }
  0xb0   :  { %704 = vadd.xlane.f32.xlu1 %v703_v37  ;;  %v411_v37 = vmul.f32 %v2536_v62, %v2101_v14 }
  0xb1   :  { %v1302_v57 = vsel %vm1117_vm2, %v1301_v47, %v1297_v52  ;;  %701 = vadd.xlane.f32.xlu0 %v700_v58  ;;  %v453_v0 = vpop.xlane.xlu1 %452  ;;  %v1019_v34 = vunpack.c.l.b16 %v844_v49  ;;  %v1020_v35 = vunpack.c.h.b16 %v844_v49  ;;  %v2785_v58 = vunpack.c.h.bf16 %v2248_v33  ;;  %v2223_v33 = vld [vmem:[%s3336_s0 + $0x168] sm:$0xff]  }
  0xb2   :  { %v2754_v61 = vsel %vm1124_vm3, %v1306_v48, %v1302_v57  ;;  %v450_v1 = vpop.xlane.xlu0 %449  ;;  %v751_v52 = vsel %vm435_vm0, %v412_v32, 0.0  ;;  %v748_v53 = vsel %vm435_vm0, %v411_v37, 0.0  ;;  %v2073_v45 = vunpack.c.l.bf16 %v2223_v33 }
  0xb3   :  { %v822_v10 = vpack.c.bf16 %v453_v0, %v450_v1  ;;  %v1371_v49 = vrot.slane %v1019_v34, %v2676_v15  ;;  %v1375_v51 = vrot.slane %v1020_v35, %v2679_v16  ;;  %v2208_v0 = vld [vmem:[%s3336_s0 + $0xf0] sm:$0xff]   ;;  %v322_v3 = vmul.f32 %v2785_v58, %v1922_v41 }
  0xb4   :  { %794 = vadd.xlane.f32.xlu1 %v793_v9 }
  0xb5   :  { %v975_v18 = vunpack.c.l.b16 %v822_v10  ;;  %v976_v19 = vunpack.c.h.b16 %v822_v10  ;;  %791 = vadd.xlane.f32.xlu0 %v790_v4  ;;  %v501_v20 = vpop.xlane.xlu1 %500  ;;  %v321_v10 = vmul.f32 %v2787_v44, %v1921_v43  ;;  %v2074_v43 = vunpack.c.h.bf16 %v2223_v33 }
  0xb6   :  { %v498_v21 = vpop.xlane.xlu0 %497 }
  0xb7   :  { %v1130_v27 = vrot.slane %v975_v18, %v2760_v5  ;;  %v1137_v28 = vrot.slane %v976_v19, %v2763_v8  ;;  %v830_v31 = vpack.c.bf16 %v501_v20, %v498_v21  ;;  %v1376_v18 = vsel %vm1110_vm1, %v1375_v51, %v1371_v49 }
  0xb8   :  { %572 = vadd.xlane.f32.xlu1 %v571_v22  ;;  %v2014_v19 = vunpack.c.h.bf16 %v2208_v0  ;;  %v2013_v20 = vunpack.c.l.bf16 %v2208_v0  ;;  %v338_v22 = vmul.f32 %v2785_v58, %v1954_v50  ;;  %v1140_v51 = vadd.s32 4294967248, %v2646_v17 }
  0xb9   :  { %v1132_v38 = vsel %vm1131_vm4, %v1130_v27, %v2714_v6  ;;  %v991_v39 = vunpack.c.l.b16 %v830_v31  ;;  %v992_v40 = vunpack.c.h.b16 %v830_v31  ;;  %569 = vadd.xlane.f32.xlu0 %v568_v23  ;;  %v591_v12 = vpop.xlane.xlu1 %590  ;;  %v481_v27 = vsel %vm435_vm0, %v322_v3, 0.0 }
  0xba   :  { %v2783_v42 = vsel %vm1138_vm5, %v1137_v28, %v1132_v38  ;;  %v588_v54 = vpop.xlane.xlu0 %587  ;;  %v478_v28 = vsel %vm435_vm0, %v321_v10, 0.0  ;;  %v337_v31 = vmul.f32 %v2787_v44, %v1953_v11  ;;  %v367_v37 = vmul.f32 %v2667_v7, %v2013_v20 }
  0xbb   :  { %v1232_v6 = vrot.slane %v991_v39, %v2760_v5  ;;  %v1237_v47 = vrot.slane %v992_v40, %v2763_v8  ;;  %v845_v48 = vpack.c.bf16 %v591_v12, %v588_v54  ;;  %v529_v12 = vsel %vm435_vm0, %v338_v22, 0.0 }
  0xbc   :  { %662 = vadd.xlane.f32.xlu1 %v661_v25  ;;  %v526_v54 = vsel %vm435_vm0, %v337_v31, 0.0  ;;  %v398_v11 = vmul.f32 %v2597_v59, %v2074_v43  ;;  %v1147_v20 = vadd.s32 4294967240, %v2646_v17 }
  0xbd   :  { %v1233_v55 = vsel %vm1131_vm4, %v1232_v6, %v2727_v24  ;;  %v1021_v57 = vunpack.c.l.b16 %v845_v48  ;;  %v1022_v46 = vunpack.c.h.b16 %v845_v48  ;;  %659 = vadd.xlane.f32.xlu0 %v658_v36  ;;  %v633_v9 = vpop.xlane.xlu1 %632  ;;  %v368_v36 = vmul.f32 %v2663_v2, %v2014_v19  ;;  %v2238_v6 = vld [vmem:[%s3336_s0 + $0x1e0] sm:$0xff]  }
  0xbe   :  { %v2804_v1 = vsel %vm1138_vm5, %v1237_v47, %v1233_v55  ;;  %v630_v4 = vpop.xlane.xlu0 %629 }
  0xbf   :  { %v1380_v24 = vrot.slane %v1021_v57, %v2689_v29  ;;  %v1385_v13 = vrot.slane %v1022_v46, %v2692_v30  ;;  %v852_v14 = vpack.c.bf16 %v633_v9, %v630_v4  ;;  %v619_v55 = vsel %vm435_vm0, %v368_v36, 0.0 }
  0xc0   :  { %752 = vadd.xlane.f32.xlu1 %v751_v52  ;;  %v616_v57 = vsel %vm435_vm0, %v367_v37, 0.0  ;;  %v2134_v9 = vunpack.c.h.bf16 %v2238_v6  ;;  %v2864_v37 = vsub.s32 %v1140_v51, %v2658_v56 }
  0xc1   :  { %v1381_v21 = vsel %vm1117_vm2, %v1380_v24, %v1376_v18  ;;  %749 = vadd.xlane.f32.xlu0 %v748_v53  ;;  %v549_v25 = vpop.xlane.xlu1 %548  ;;  %v1035_v34 = vunpack.c.l.b16 %v852_v14  ;;  %v1036_v35 = vunpack.c.h.b16 %v852_v14  ;;  %v397_v24 = vmul.f32 %v2599_v63, %v2073_v45  ;;  %v2201_v14 = vld [vmem:[%s3336_s0 + $0xb8] sm:$0xff]  }
  0xc2   :  { %v2814_v23 = vsel %vm1124_vm3, %v1385_v13, %v1381_v21  ;;  %v546_v26 = vpop.xlane.xlu0 %545  ;;  %v2133_v13 = vunpack.c.l.bf16 %v2238_v6 }
  0xc3   :  { %v838_v32 = vpack.c.bf16 %v549_v25, %v546_v26  ;;  %v1450_v52 = vrot.slane %v1035_v34, %v2676_v15  ;;  %v1454_v53 = vrot.slane %v1036_v35, %v2679_v16  ;;  %v428_v25 = vmul.f32 %v2534_v60, %v2134_v9  ;;  %v2209_v9 = vld [vmem:[%s3336_s0 + $0xf8] sm:$0xff]  }
  0xc4   :  { %482 = vadd.xlane.f32.xlu1 %v481_v27  ;;  %v1986_v26 = vunpack.c.h.bf16 %v2201_v14  ;;  %v1985_v27 = vunpack.c.l.bf16 %v2201_v14  ;;  %v709_v34 = vsel %vm435_vm0, %v398_v11, 0.0  ;;  %v706_v35 = vsel %vm435_vm0, %v397_v24, 0.0 }
  0xc5   :  { %v1007_v38 = vunpack.c.l.b16 %v838_v32  ;;  %v1008_v39 = vunpack.c.h.b16 %v838_v32  ;;  %479 = vadd.xlane.f32.xlu0 %v478_v28  ;;  %v639_v40 = vpop.xlane.xlu1 %638  ;;  %v1455_v21 = vsel %vm1110_vm1, %v1454_v53, %v1450_v52  ;;  %v2216_v28 = vld [vmem:[%s3336_s0 + $0x130] sm:$0xff]   ;;  %v427_v36 = vmul.f32 %v2536_v62, %v2133_v13  ;;  %v2231_v52 = vld [vmem:[%s3336_s0 + $0x1a8] sm:$0xff]  }
  0xc6   :  { %v636_v41 = vpop.xlane.xlu0 %635  ;;  %v2867_v60 = vsub.s32 %v1147_v20, %v2658_v56  ;;  %v799_v62 = vsel %vm435_vm0, %v428_v25, 0.0  ;;  %v2106_v13 = vunpack.c.h.bf16 %v2231_v52  ;;  %v2105_v14 = vunpack.c.l.bf16 %v2231_v52 }
  0xc7   :  { %v1311_v47 = vrot.slane %v1007_v38, %v2760_v5  ;;  %v1316_v48 = vrot.slane %v1008_v39, %v2763_v8  ;;  %v853_v49 = vpack.c.bf16 %v639_v40, %v636_v41  ;;  %v2046_v39 = vunpack.c.h.bf16 %v2216_v28 }
  0xc8   :  { %530 = vadd.xlane.f32.xlu1 %v529_v12  ;;  %v2045_v40 = vunpack.c.l.bf16 %v2216_v28  ;;  %v796_v6 = vsel %vm435_vm0, %v427_v36, 0.0  ;;  %v2017_v25 = vunpack.c.l.bf16 %v2209_v9 }
  0xc9   :  { %v1312_v46 = vsel %vm1131_vm4, %v1311_v47, %v2754_v61  ;;  %v1037_v50 = vunpack.c.l.b16 %v853_v49  ;;  %v1038_v0 = vunpack.c.h.b16 %v853_v49  ;;  %527 = vadd.xlane.f32.xlu0 %v526_v54  ;;  %v681_v3 = vpop.xlane.xlu1 %680  ;;  %v354_v54 = vmul.f32 %v2785_v58, %v1986_v26 }
  0xca   :  { %v2839_v4 = vsel %vm1138_vm5, %v1316_v48, %v1312_v46  ;;  %v678_v10 = vpop.xlane.xlu0 %677  ;;  %v353_v47 = vmul.f32 %v2787_v44, %v1985_v27  ;;  %v384_v53 = vmul.f32 %v2663_v2, %v2046_v39 }
  0xcb   :  { %v1459_v61 = vrot.slane %v1037_v50, %v2689_v29  ;;  %v1464_v18 = vrot.slane %v1038_v0, %v2692_v30  ;;  %v2848_v19 = vpack.c.bf16 %v681_v3, %v678_v10  ;;  %v577_v0 = vsel %vm435_vm0, %v354_v54, 0.0 }
  0xcc   :  { %620 = vadd.xlane.f32.xlu1 %v619_v55  ;;  %v383_v55 = vmul.f32 %v2667_v7, %v2045_v40  ;;  %v574_v24 = vsel %vm435_vm0, %v353_v47, 0.0 }
  0xcd   :  { %v1460_v22 = vsel %vm1117_vm2, %v1459_v61, %v1455_v21  ;;  %617 = vadd.xlane.f32.xlu0 %v616_v57  ;;  %v459_v32 = vpop.xlane.xlu1 %458  ;;  %v1051_v20 = vunpack.c.l.b16 %v2848_v19  ;;  %v1052_v21 = vunpack.c.h.b16 %v2848_v19  ;;  %v414_v19 = vmul.f32 %v2597_v59, %v2106_v13 }
  0xce   :  { %v2858_v31 = vsel %vm1124_vm3, %v1464_v18, %v1460_v22  ;;  %v456_v33 = vpop.xlane.xlu0 %455  ;;  %v2018_v22 = vunpack.c.h.bf16 %v2209_v9  ;;  %v664_v36 = vsel %vm435_vm0, %v383_v55, 0.0 }
  0xcf   :  { %v823_v38 = vpack.c.bf16 %v459_v32, %v456_v33  ;;  %v667_v32 = vsel %vm435_vm0, %v384_v53, 0.0  ;;  %v1533_v54 = vrot.slane %v1052_v21, %v2679_v16  ;;  %v757_v53 = vsel %vm435_vm0, %v414_v19, 0.0 }
  0xd0   :  { %710 = vadd.xlane.f32.xlu1 %v709_v34 }
  0xd1   :  { %v977_v41 = vunpack.c.l.b16 %v823_v38  ;;  %v978_v12 = vunpack.c.h.b16 %v823_v38  ;;  %707 = vadd.xlane.f32.xlu0 %v706_v35  ;;  %v507_v43 = vpop.xlane.xlu1 %506  ;;  %v413_v38 = vmul.f32 %v2599_v63, %v2105_v14 }
  0xd2   :  { %v504_v45 = vpop.xlane.xlu0 %503 }
  0xd3   :  { %v1144_v48 = vrot.slane %v977_v41, %v2864_v37  ;;  %v1151_v49 = vrot.slane %v978_v12, %v2867_v60  ;;  %v831_v51 = vpack.c.bf16 %v507_v43, %v504_v45  ;;  %v1529_v12 = vrot.slane %v1051_v20, %v2676_v15 }
  0xd4   :  { %800 = vadd.xlane.f32.xlu1 %v799_v62  ;;  %v370_v43 = vmul.f32 %v2785_v58, %v2018_v22  ;;  %v369_v45 = vmul.f32 %v2787_v44, %v2017_v25  ;;  %v754_v55 = vsel %vm435_vm0, %v413_v38, 0.0 }
  0xd5   :  { %v1146_v57 = vsel %vm1145_vm6, %v1144_v48, %v2783_v42  ;;  %v993_v46 = vunpack.c.l.b16 %v831_v51  ;;  %v994_v50 = vunpack.c.h.b16 %v831_v51  ;;  %797 = vadd.xlane.f32.xlu0 %v796_v6  ;;  %v597_v10 = vpop.xlane.xlu1 %596  ;;  %v1534_v9 = vsel %vm1110_vm1, %v1533_v54, %v1529_v12 }
  0xd6   :  { %v2887_v3 = vsel %vm1152_vm7, %v1151_v49, %v1146_v57  ;;  %v594_v11 = vpop.xlane.xlu0 %593  ;;  %v622_v13 = vsel %vm435_vm0, %v369_v45, 0.0 }
  0xd7   :  { %v1242_v42 = vrot.slane %v993_v46, %v2864_v37  ;;  %v1247_v61 = vrot.slane %v994_v50, %v2867_v60  ;;  %v846_v18 = vpack.c.bf16 %v597_v10, %v594_v11  ;;  %v2217_v10 = vld [vmem:[%s3336_s0 + $0x138] sm:$0xff]  }
  0xd8   :  { %578 = vadd.xlane.f32.xlu1 %v577_v0  ;;  %v2239_v0 = vld [vmem:[%s3336_s0 + $0x1e8] sm:$0xff]  }
  0xd9   :  { %v1243_v26 = vsel %vm1145_vm6, %v1242_v42, %v2804_v1  ;;  %v1023_v27 = vunpack.c.l.b16 %v846_v18  ;;  %v1024_v28 = vunpack.c.h.b16 %v846_v18  ;;  %575 = vadd.xlane.f32.xlu0 %v574_v24  ;;  %v687_v34 = vpop.xlane.xlu1 %686  ;;  %v2224_v1 = vld [vmem:[%s3336_s0 + $0x170] sm:$0xff]   ;;  %v625_v24 = vsel %vm435_vm0, %v370_v43, 0.0 }
  0xda   :  { %v2898_v33 = vsel %vm1152_vm7, %v1247_v61, %v1243_v26  ;;  %v684_v35 = vpop.xlane.xlu0 %683  ;;  %v2078_v48 = vunpack.c.h.bf16 %v2224_v1  ;;  %v2077_v57 = vunpack.c.l.bf16 %v2224_v1  ;;  %v2138_v21 = vunpack.c.h.bf16 %v2239_v0 }
  0xdb   :  { %v1390_v39 = vrot.slane %v1023_v27, %v2760_v5  ;;  %v1395_v40 = vrot.slane %v1024_v28, %v2763_v8  ;;  %v861_v41 = vpack.c.bf16 %v687_v34, %v684_v35  ;;  %v2137_v22 = vunpack.c.l.bf16 %v2239_v0  ;;  %v2232_v34 = vld [vmem:[%s3336_s0 + $0x1b0] sm:$0xff]   ;;  %v2225_v0 = vld [vmem:[%s3336_s0 + $0x178] sm:$0xff]  }
  0xdc   :  { %668 = vadd.xlane.f32.xlu1 %v667_v32  ;;  %v400_v14 = vmul.f32 %v2663_v2, %v2078_v48  ;;  %v399_v20 = vmul.f32 %v2667_v7, %v2077_v57  ;;  %v2050_v26 = vunpack.c.h.bf16 %v2217_v10  ;;  %v2049_v27 = vunpack.c.l.bf16 %v2217_v10 }
  0xdd   :  { %v1391_v62 = vsel %vm1131_vm4, %v1390_v39, %v2814_v23  ;;  %v1053_v6 = vunpack.c.l.b16 %v861_v41  ;;  %v1054_v47 = vunpack.c.h.b16 %v861_v41  ;;  %665 = vadd.xlane.f32.xlu0 %v664_v36  ;;  %v729_v51 = vpop.xlane.xlu1 %728  ;;  %v430_v1 = vmul.f32 %v2597_v59, %v2138_v21 }
  0xde   :  { %v2915_v49 = vsel %vm1138_vm5, %v1395_v40, %v1391_v62  ;;  %v726_v52 = vpop.xlane.xlu0 %725  ;;  %v715_v19 = vsel %vm435_vm0, %v400_v14, 0.0  ;;  %v712_v38 = vsel %vm435_vm0, %v399_v20, 0.0  ;;  %v429_v39 = vmul.f32 %v2599_v63, %v2137_v22  ;;  %v2240_v20 = vld [vmem:[%s3336_s0 + $0x1f0] sm:$0xff]  }
  0xdf   :  { %v1538_v46 = vrot.slane %v1053_v6, %v2689_v29  ;;  %v1543_v50 = vrot.slane %v1054_v47, %v2692_v30  ;;  %v868_v23 = vpack.c.bf16 %v729_v51, %v726_v52  ;;  %v386_v54 = vmul.f32 %v2785_v58, %v2050_v26 }
  0xe0   :  { %758 = vadd.xlane.f32.xlu1 %v757_v53  ;;  %v385_v62 = vmul.f32 %v2787_v44, %v2049_v27  ;;  %v2110_v6 = vunpack.c.h.bf16 %v2232_v34  ;;  %v2109_v59 = vunpack.c.l.bf16 %v2232_v34  ;;  %v802_v57 = vsel %vm435_vm0, %v429_v39, 0.0 }
  0xe1   :  { %v1539_v11 = vsel %vm1117_vm2, %v1538_v46, %v1534_v9  ;;  %755 = vadd.xlane.f32.xlu0 %v754_v55  ;;  %v555_v61 = vpop.xlane.xlu1 %554  ;;  %v1067_v43 = vunpack.c.l.b16 %v868_v23  ;;  %v1068_v45 = vunpack.c.h.b16 %v868_v23  ;;  %v805_v55 = vsel %vm435_vm0, %v430_v1, 0.0 }
  0xe2   :  { %v2933_v42 = vsel %vm1124_vm3, %v1543_v50, %v1539_v11  ;;  %v552_v18 = vpop.xlane.xlu0 %551  ;;  %v670_v11 = vsel %vm435_vm0, %v385_v62, 0.0  ;;  %v1154_v26 = vadd.s32 4294967232, %v2646_v17  ;;  %v2082_v27 = vunpack.c.h.bf16 %v2225_v0 }
  0xe3   :  { %v839_v25 = vpack.c.bf16 %v555_v61, %v552_v18  ;;  %v1608_v9 = vrot.slane %v1067_v43, %v2676_v15  ;;  %v1612_v10 = vrot.slane %v1068_v45, %v2679_v16  ;;  %v415_v18 = vmul.f32 %v2667_v7, %v2109_v59 }
  0xe4   :  { %626 = vadd.xlane.f32.xlu1 %v625_v24  ;;  %v416_v24 = vmul.f32 %v2663_v2, %v2110_v6  ;;  %v402_v43 = vmul.f32 %v2785_v58, %v2082_v27  ;;  %v2141_v62 = vunpack.c.l.bf16 %v2240_v20  ;;  %v2992_v6 = vsub.s32 %v1154_v26, %v2658_v56 }
  0xe5   :  { %v1009_v28 = vunpack.c.l.b16 %v839_v25  ;;  %v1010_v32 = vunpack.c.h.b16 %v839_v25  ;;  %623 = vadd.xlane.f32.xlu0 %v622_v13  ;;  %v645_v35 = vpop.xlane.xlu1 %644  ;;  %v760_v39 = vsel %vm435_vm0, %v415_v18, 0.0 }
  0xe6   :  { %v642_v36 = vpop.xlane.xlu0 %641  ;;  %v763_v1 = vsel %vm435_vm0, %v416_v24, 0.0 }
  0xe7   :  { %v1321_v40 = vrot.slane %v1009_v28, %v2864_v37  ;;  %v1326_v41 = vrot.slane %v1010_v32, %v2867_v60  ;;  %v854_v12 = vpack.c.bf16 %v645_v35, %v642_v36  ;;  %v2081_v28 = vunpack.c.l.bf16 %v2225_v0 }
  0xe8   :  { %716 = vadd.xlane.f32.xlu1 %v715_v19  ;;  %v1161_v35 = vadd.s32 4294967224, %v2646_v17  ;;  %v1613_v36 = vsel %vm1110_vm1, %v1612_v10, %v1608_v9  ;;  %v2142_v19 = vunpack.c.h.bf16 %v2240_v20  ;;  %v2241_v10 = vld [vmem:[%s3336_s0 + $0x1f8] sm:$0xff]  }
  0xe9   :  { %v1322_v47 = vsel %vm1145_vm6, %v1321_v40, %v2839_v4  ;;  %v1039_v48 = vunpack.c.l.b16 %v854_v12  ;;  %v1040_v51 = vunpack.c.h.b16 %v854_v12  ;;  %713 = vadd.xlane.f32.xlu0 %v712_v38  ;;  %v735_v52 = vpop.xlane.xlu1 %734  ;;  %v673_v4 = vsel %vm435_vm0, %v386_v54, 0.0  ;;  %v2233_v40 = vld [vmem:[%s3336_s0 + $0x1b8] sm:$0xff]  }
  0xea   :  { %v2950_v63 = vsel %vm1152_vm7, %v1326_v41, %v1322_v47  ;;  %v732_v53 = vpop.xlane.xlu0 %731  ;;  %v401_v45 = vmul.f32 %v2787_v44, %v2081_v28  ;;  %v2995_v47 = vsub.s32 %v1161_v35, %v2658_v56  ;;  %v2114_v59 = vunpack.c.h.bf16 %v2233_v40 }
  0xeb   :  { %v1469_v46 = vrot.slane %v1039_v48, %v2760_v5  ;;  %v1474_v50 = vrot.slane %v1040_v51, %v2763_v8  ;;  %v869_v23 = vpack.c.bf16 %v735_v52, %v732_v53  ;;  %v432_v51 = vmul.f32 %v2663_v2, %v2142_v19 }
  0xec   :  { %806 = vadd.xlane.f32.xlu1 %v805_v55  ;;  %v2113_v55 = vunpack.c.l.bf16 %v2233_v40  ;;  %v418_v24 = vmul.f32 %v2785_v58, %v2114_v59  ;;  %v2146_v26 = vunpack.c.h.bf16 %v2241_v10  ;;  %v2145_v27 = vunpack.c.l.bf16 %v2241_v10 }
  0xed   :  { %v1470_v13 = vsel %vm1131_vm4, %v1469_v46, %v2858_v31  ;;  %v1069_v14 = vunpack.c.l.b16 %v869_v23  ;;  %v1070_v61 = vunpack.c.h.b16 %v869_v23  ;;  %803 = vadd.xlane.f32.xlu0 %v802_v57  ;;  %v777_v22 = vpop.xlane.xlu1 %776  ;;  %v718_v23 = vsel %vm435_vm0, %v401_v45, 0.0 }
  0xee   :  { %v2971_v21 = vsel %vm1138_vm5, %v1474_v50, %v1470_v13  ;;  %v774_v25 = vpop.xlane.xlu0 %773  ;;  %v721_v50 = vsel %vm435_vm0, %v402_v43, 0.0  ;;  %v2281_v43 = vld [vmem:[%s3338_s2] sm:$0xff]  }
  0xef   :  { %v1617_v31 = vrot.slane %v1069_v14, %v2689_v29  ;;  %v1622_v32 = vrot.slane %v1070_v61, %v2692_v30  ;;  %v2976_v34 = vpack.c.bf16 %v777_v22, %v774_v25 }
  0xf0   :  { %674 = vadd.xlane.f32.xlu1 %v673_v4  ;;  %v431_v4 = vmul.f32 %v2667_v7, %v2141_v62  ;;  %v417_v7 = vmul.f32 %v2787_v44, %v2113_v55 }
  0xf1   :  { %v1618_v38 = vsel %vm1117_vm2, %v1617_v31, %v1613_v36  ;;  %671 = vadd.xlane.f32.xlu0 %v670_v11  ;;  %v465_v12 = vpop.xlane.xlu1 %464  ;;  %v811_v11 = vsel %vm435_vm0, %v432_v51, 0.0  ;;  %v1083_v51 = vunpack.c.l.b16 %v2976_v34  ;;  %v1084_v59 = vunpack.c.h.b16 %v2976_v34  ;;  %v2282_v34 = vld [vmem:[%s3338_s2 + $0x8] sm:$0xff]  }
  0xf2   :  { %v2987_v41 = vsel %vm1124_vm3, %v1622_v32, %v1618_v38  ;;  %v462_v54 = vpop.xlane.xlu0 %461  ;;  %v808_v25 = vsel %vm435_vm0, %v431_v4, 0.0  ;;  %v769_v32 = vsel %vm435_vm0, %v418_v24, 0.0  ;;  %v766_v38 = vsel %vm435_vm0, %v417_v7, 0.0 }
  0xf3   :  { %v824_v48 = vpack.c.bf16 %v465_v12, %v462_v54  ;;  %v434_v12 = vmul.f32 %v2785_v58, %v2146_v26  ;;  %v433_v54 = vmul.f32 %v2787_v44, %v2145_v27 }
  0xf4   :  { %764 = vadd.xlane.f32.xlu1 %v763_v1 }
  0xf5   :  { %v979_v52 = vunpack.c.l.b16 %v824_v48  ;;  %v980_v53 = vunpack.c.h.b16 %v824_v48  ;;  %761 = vadd.xlane.f32.xlu0 %v760_v39  ;;  %v513_v57 = vpop.xlane.xlu1 %512  ;;  %v2313_v48 = vmov 0.0  }
  0xf6   :  { %v510_v46 = vpop.xlane.xlu0 %509  ;;  %2258 = vmatprep.subr.bf16.mxu0 %v2313_v48  ;;  %2274 = vmatprep.mubr.msk.bf16.mxu0 %vm2314_vm12, %v2313_v48 }
  0xf7   :  { %v1158_v0 = vrot.slane %v979_v52, %v2992_v6  ;;  %v1165_v2 = vrot.slane %v980_v53, %v2995_v47  ;;  %v832_v9 = vpack.c.bf16 %v513_v57, %v510_v46  ;;  %2259 = vmatpush3.bf16.msra.mxu0 %v2281_v43  ;;  %v817_v46 = vsel %vm435_vm0, %v434_v12, 0.0  ;;  %v2285_v12 = vld [vmem:[%s3338_s2 + $0x20] sm:$0xff]  }
  0xf8   :  { %722 = vadd.xlane.f32.xlu1 %v721_v50  ;;  %v814_v50 = vsel %vm435_vm0, %v433_v54, 0.0  ;;  %2260 = vmatprep.subr.bf16.mxu0 %v2313_v48  ;;  %vm1208_vm0 = vcmask 1048512  }
  0xf9   :  { %v1160_v13 = vsel %vm1159_vm8, %v1158_v0, %v2887_v3  ;;  %v995_v14 = vunpack.c.l.b16 %v832_v9  ;;  %v996_v61 = vunpack.c.h.b16 %v832_v9  ;;  %719 = vadd.xlane.f32.xlu0 %v718_v23  ;;  %v603_v20 = vpop.xlane.xlu1 %602  ;;  %v1687_v0 = vrot.slane %v1083_v51, %v2676_v15  ;;  %v2283_v15 = vld [vmem:[%s3338_s2 + $0x10] sm:$0xff]  }
  0xfa   :  { %v3012_v18 = vsel %vm1166_vm9, %v1165_v2, %v1160_v13  ;;  %v600_v22 = vpop.xlane.xlu0 %599  ;;  %v1691_v2 = vrot.slane %v1084_v59, %v2679_v16 }
  0xfb   :  { %v1252_v28 = vrot.slane %v995_v14, %v2992_v6  ;;  %v1257_v31 = vrot.slane %v996_v61, %v2995_v47  ;;  %v847_v3 = vpack.c.bf16 %v603_v20, %v600_v22  ;;  %2261 = vmatpush3.bf16.msra.mxu0 %v2282_v34 }
  0xfc   :  { %812 = vadd.xlane.f32.xlu1 %v811_v11  ;;  %2262 = vmatprep.subr.bf16.mxu0 %v2313_v48  ;;  %v1692_v7 = vsel %vm1110_vm1, %v1691_v2, %v1687_v0  ;;  %vm1763_vm1 = vcmask 1041409  }
  0xfd   :  { %v1253_v35 = vsel %vm1159_vm8, %v1252_v28, %v2898_v33  ;;  %v1025_v36 = vunpack.c.l.b16 %v847_v3  ;;  %v1026_v19 = vunpack.c.h.b16 %v847_v3  ;;  %809 = vadd.xlane.f32.xlu0 %v808_v25  ;;  %v693_v39 = vpop.xlane.xlu1 %692 }
  0xfe   :  { %v3022_v1 = vsel %vm1166_vm9, %v1257_v31, %v1253_v35  ;;  %v690_v40 = vpop.xlane.xlu0 %689 }
  0xff   :  { %v1400_v33 = vrot.slane %v1025_v36, %v2864_v37  ;;  %v1405_v45 = vrot.slane %v1026_v19, %v2867_v60  ;;  %v862_v62 = vpack.c.bf16 %v693_v39, %v690_v40  ;;  %2263 = vmatpush3.bf16.msra.mxu0 %v2283_v15  ;;  %v1168_v40 = vadd.s32 4294967216, %v2646_v17 }
 0x100   :  { %770 = vadd.xlane.f32.xlu1 %v769_v32  ;;  %2264 = vmatprep.subr.bf16.mxu0 %v2313_v48 }
 0x101   :  { %v1401_v58 = vsel %vm1145_vm6, %v1400_v33, %v2915_v49  ;;  %v1055_v44 = vunpack.c.l.b16 %v862_v62  ;;  %v1056_v52 = vunpack.c.h.b16 %v862_v62  ;;  %767 = vadd.xlane.f32.xlu0 %v766_v38  ;;  %v783_v55 = vpop.xlane.xlu1 %782  ;;  %v1175_v33 = vadd.s32 4294967208, %v2646_v17 }
 0x102   :  { %v3037_v53 = vsel %vm1152_vm7, %v1405_v45, %v1401_v58  ;;  %v780_v57 = vpop.xlane.xlu0 %779 }
 0x103   :  { %v1548_v49 = vrot.slane %v1055_v44, %v2760_v5  ;;  %v1553_v23 = vrot.slane %v1056_v52, %v2763_v8  ;;  %v877_v4 = vpack.c.bf16 %v783_v55, %v780_v57  ;;  %v3091_v44 = vsub.s32 %v1168_v40, %v2658_v56  ;;  %v2286_v55 = vld [vmem:[%s3338_s2 + $0x28] sm:$0xff]  }
 0x104   :  { %818 = vadd.xlane.f32.xlu1 %v817_v46  ;;  %v3099_v46 = vsub.s32 %v1175_v33, %v2658_v56 }
 0x105   :  { %v1549_v9 = vsel %vm1131_vm4, %v1548_v49, %v2933_v42  ;;  %v1085_v10 = vunpack.c.l.b16 %v877_v4  ;;  %v1086_v11 = vunpack.c.h.b16 %v877_v4  ;;  %815 = vadd.xlane.f32.xlu0 %v814_v50  ;;  %v561_v13 = vpop.xlane.xlu1 %560 }
 0x106   :  { %v3052_v24 = vsel %vm1138_vm5, %v1553_v23, %v1549_v9  ;;  %v558_v14 = vpop.xlane.xlu0 %557  ;;  %v2287_v9 = vld [vmem:[%s3338_s2 + $0x30] sm:$0xff]  }
 0x107   :  { %v1696_v16 = vrot.slane %v1085_v10, %v2689_v29  ;;  %v1701_v61 = vrot.slane %v1086_v11, %v2692_v30  ;;  %v840_v42 = vpack.c.bf16 %v561_v13, %v558_v14  ;;  %v2284_v29 = vld [vmem:[%s3338_s2 + $0x18] sm:$0xff]  }
 0x108   :  { %2265 = vmatpush3.bf16.msra.mxu0 %v2284_v29  ;;  %v2288_v13 = vld [vmem:[%s3338_s2 + $0x38] sm:$0xff]  }
 0x109   :  { %v1697_v20 = vsel %vm1117_vm2, %v1696_v16, %v1692_v7  ;;  %v1011_v22 = vunpack.c.l.b16 %v840_v42  ;;  %v1012_v25 = vunpack.c.h.b16 %v840_v42  ;;  %v651_v27 = vpop.xlane.xlu1 %650  ;;  %2266 = vmatprep.subr.bf16.mxu0 %v2313_v48  ;;  %vm1765_vm2 = vcmask 1042434  }
 0x10a   :  { %v3064_v26 = vsel %vm1124_vm3, %v1701_v61, %v1697_v20  ;;  %v648_v28 = vpop.xlane.xlu0 %647  ;;  %vm1767_vm3 = vcmask 1043459  }
 0x10b   :  { %v1331_v30 = vrot.slane %v1011_v22, %v2992_v6  ;;  %v1336_v31 = vrot.slane %v1012_v25, %v2995_v47  ;;  %v855_v3 = vpack.c.bf16 %v651_v27, %v648_v28 }
 0x10c   :  { %2267 = vmatpush3.bf16.msra.mxu0 %v2285_v12 }
 0x10d   :  { %v1332_v32 = vsel %vm1159_vm8, %v1331_v30, %v2950_v63  ;;  %v1041_v35 = vunpack.c.l.b16 %v855_v3  ;;  %v1042_v36 = vunpack.c.h.b16 %v855_v3  ;;  %v741_v38 = vpop.xlane.xlu1 %740  ;;  %2268 = vmatprep.subr.bf16.mxu0 %v2313_v48 }
 0x10e   :  { %v3075_v19 = vsel %vm1166_vm9, %v1336_v31, %v1332_v32  ;;  %v738_v39 = vpop.xlane.xlu0 %737 }
 0x10f   :  { %v1479_v54 = vrot.slane %v1041_v35, %v2864_v37  ;;  %v1484_v43 = vrot.slane %v1042_v36, %v2867_v60  ;;  %v870_v63 = vpack.c.bf16 %v741_v38, %v738_v39 }
 0x110   :  { %2269 = vmatpush3.bf16.msra.mxu0 %v2286_v55 }
 0x111   :  { %v1480_v45 = vsel %vm1145_vm6, %v1479_v54, %v2971_v21  ;;  %v1071_v62 = vunpack.c.l.b16 %v870_v63  ;;  %v1072_v51 = vunpack.c.h.b16 %v870_v63  ;;  %v471_v58 = vpop.xlane.xlu1 %470  ;;  %2270 = vmatprep.subr.bf16.mxu0 %v2313_v48 }
 0x112   :  { %v3088_v59 = vsel %vm1152_vm7, %v1484_v43, %v1480_v45  ;;  %v468_v52 = vpop.xlane.xlu0 %467 }
 0x113   :  { %v1627_v57 = vrot.slane %v1071_v62, %v2760_v5  ;;  %v1632_v21 = vrot.slane %v1072_v51, %v2763_v8  ;;  %v825_v50 = vpack.c.bf16 %v471_v58, %v468_v52 }
 0x114   :  { %2271 = vmatpush3.bf16.msra.mxu0 %v2287_v9 }
 0x115   :  { %v1628_v34 = vsel %vm1131_vm4, %v1627_v57, %v2987_v41  ;;  %v981_v49 = vunpack.c.l.b16 %v825_v50  ;;  %v982_v23 = vunpack.c.h.b16 %v825_v50  ;;  %v519_v0 = vpop.xlane.xlu1 %518  ;;  %2272 = vmatprep.subr.bf16.mxu0 %v2313_v48 }
 0x116   :  { %v3105_v4 = vsel %vm1138_vm5, %v1632_v21, %v1628_v34  ;;  %v516_v2 = vpop.xlane.xlu0 %515 }
 0x117   :  { %v1172_v10 = vrot.slane %v981_v49, %v3091_v44  ;;  %v1179_v11 = vrot.slane %v982_v23, %v3099_v46  ;;  %v833_v41 = vpack.c.bf16 %v519_v0, %v516_v2 }
 0x118   :  { %2273 = vmatpush3.bf16.msra.mxu0 %v2288_v13 }
 0x119   :  { %v1174_v14 = vsel %vm1173_vm10, %v1172_v10, %v3012_v18  ;;  %v997_v15 = vunpack.c.l.b16 %v833_v41  ;;  %v998_v16 = vunpack.c.h.b16 %v833_v41  ;;  %v609_v42 = vpop.xlane.xlu1 %608  ;;  %v1182_v41 = vadd.s32 4294967200, %v2646_v17 }
 0x11a   :  { %v3120_v61 = vsel %vm1180_vm11, %v1179_v11, %v1174_v14  ;;  %v606_v7 = vpop.xlane.xlu0 %605 }
 0x11b   :  { %v1262_v20 = vrot.slane %v997_v15, %v3091_v44  ;;  %v1267_v22 = vrot.slane %v998_v16, %v3099_v46  ;;  %v848_v25 = vpack.c.bf16 %v609_v42, %v606_v7  ;;  %v1189_v16 = vadd.s32 4294967192, %v2646_v17 }
 0x11d   :  { %v1263_v27 = vsel %vm1173_vm10, %v1262_v20, %v3022_v1  ;;  %v1027_v28 = vunpack.c.l.b16 %v848_v25  ;;  %v1028_v18 = vunpack.c.h.b16 %v848_v25  ;;  %v699_v48 = vpop.xlane.xlu1 %698  ;;  %v3167_v25 = vsub.s32 %v1182_v41, %v2658_v56 }
 0x11e   :  { %v3127_v29 = vsel %vm1180_vm11, %v1267_v22, %v1263_v27  ;;  %v696_v30 = vpop.xlane.xlu0 %695 }
 0x11f   :  { %v1410_v31 = vrot.slane %v1027_v28, %v2992_v6  ;;  %v1415_v3 = vrot.slane %v1028_v18, %v2995_v47  ;;  %v863_v32 = vpack.c.bf16 %v699_v48, %v696_v30  ;;  %v3172_v48 = vsub.s32 %v1189_v16, %v2658_v56 }
 0x121   :  { %v1411_v35 = vsel %vm1159_vm8, %v1410_v31, %v3037_v53  ;;  %v1057_v36 = vunpack.c.l.b16 %v863_v32  ;;  %v1058_v38 = vunpack.c.h.b16 %v863_v32  ;;  %v789_v1 = vpop.xlane.xlu1 %788 }
 0x122   :  { %v3134_v39 = vsel %vm1166_vm9, %v1415_v3, %v1411_v35  ;;  %v786_v40 = vpop.xlane.xlu0 %785 }
 0x123   :  { %v1558_v12 = vrot.slane %v1057_v36, %v2864_v37  ;;  %v1563_v54 = vrot.slane %v1058_v38, %v2867_v60  ;;  %v878_v43 = vpack.c.bf16 %v789_v1, %v786_v40 }
 0x125   :  { %v1559_v63 = vsel %vm1145_vm6, %v1558_v12, %v3052_v24  ;;  %v1087_v33 = vunpack.c.l.b16 %v878_v43  ;;  %v1088_v45 = vunpack.c.h.b16 %v878_v43  ;;  %v567_v53 = vpop.xlane.xlu1 %566 }
 0x126   :  { %v3141_v62 = vsel %vm1152_vm7, %v1563_v54, %v1559_v63  ;;  %v564_v51 = vpop.xlane.xlu0 %563 }
 0x127   :  { %v1706_v58 = vrot.slane %v1087_v33, %v2760_v5  ;;  %v1711_v52 = vrot.slane %v1088_v45, %v2763_v8  ;;  %v841_v55 = vpack.c.bf16 %v567_v53, %v564_v51 }
 0x129   :  { %v1707_v57 = vsel %vm1131_vm4, %v1706_v58, %v3064_v26  ;;  %v1013_v21 = vunpack.c.l.b16 %v841_v55  ;;  %v1014_v50 = vunpack.c.h.b16 %v841_v55  ;;  %v657_v24 = vpop.xlane.xlu1 %656  ;;  %vm1769_vm4 = vcmask 1044484  }
 0x12a   :  { %v3148_v34 = vsel %vm1138_vm5, %v1711_v52, %v1707_v57  ;;  %v654_v49 = vpop.xlane.xlu0 %653  ;;  %vm1771_vm5 = vcmask 1045509  }
 0x12b   :  { %v1341_v23 = vrot.slane %v1013_v21, %v3091_v44  ;;  %v1346_v0 = vrot.slane %v1014_v50, %v3099_v46  ;;  %v856_v2 = vpack.c.bf16 %v657_v24, %v654_v49 }
 0x12d   :  { %v1342_v5 = vsel %vm1173_vm10, %v1341_v23, %v3075_v19  ;;  %v1043_v8 = vunpack.c.l.b16 %v856_v2  ;;  %v1044_v9 = vunpack.c.h.b16 %v856_v2  ;;  %v747_v26 = vpop.xlane.xlu1 %746 }
 0x12e   :  { %v3155_v10 = vsel %vm1180_vm11, %v1346_v0, %v1342_v5  ;;  %v744_v11 = vpop.xlane.xlu0 %743 }
 0x12f   :  { %v1489_v13 = vrot.slane %v1043_v8, %v2992_v6  ;;  %v1494_v14 = vrot.slane %v1044_v9, %v2995_v47  ;;  %v871_v15 = vpack.c.bf16 %v747_v26, %v744_v11 }
 0x131   :  { %v1490_v42 = vsel %vm1159_vm8, %v1489_v13, %v3088_v59  ;;  %v1073_v19 = vunpack.c.l.b16 %v871_v15  ;;  %v1074_v7 = vunpack.c.h.b16 %v871_v15  ;;  %v477_v22 = vpop.xlane.xlu1 %476 }
 0x132   :  { %v3164_v20 = vsel %vm1166_vm9, %v1494_v14, %v1490_v42  ;;  %v474_v27 = vpop.xlane.xlu0 %473 }
 0x133   :  { %v1637_v28 = vrot.slane %v1073_v19, %v2864_v37  ;;  %v1642_v18 = vrot.slane %v1074_v7, %v2867_v60  ;;  %v826_v30 = vpack.c.bf16 %v477_v22, %v474_v27 }
 0x135   :  { %v1638_v59 = vsel %vm1145_vm6, %v1637_v28, %v3105_v4  ;;  %v983_v31 = vunpack.c.l.b16 %v826_v30  ;;  %v984_v3 = vunpack.c.h.b16 %v826_v30  ;;  %v525_v35 = vpop.xlane.xlu1 %524 }
 0x136   :  { %v3177_v32 = vsel %vm1152_vm7, %v1642_v18, %v1638_v59  ;;  %v522_v36 = vpop.xlane.xlu0 %521 }
 0x137   :  { %v1186_v38 = vrot.slane %v983_v31, %v3167_v25  ;;  %v1193_v1 = vrot.slane %v984_v3, %v3172_v48  ;;  %v834_v40 = vpack.c.bf16 %v525_v35, %v522_v36 }
 0x139   :  { %v1188_v12 = vsel %vm1187_vm13, %v1186_v38, %v3120_v61  ;;  %v999_v54 = vunpack.c.l.b16 %v834_v40  ;;  %v1000_v43 = vunpack.c.h.b16 %v834_v40  ;;  %v615_v63 = vpop.xlane.xlu1 %614 }
 0x13a   :  { %v3184_v4 = vsel %vm1194_vm14, %v1193_v1, %v1188_v12  ;;  %v612_v33 = vpop.xlane.xlu0 %611  ;;  %v1196_v12 = vadd.s32 4294967184, %v2646_v17 }
 0x13b   :  { %v1272_v45 = vrot.slane %v999_v54, %v3167_v25  ;;  %v1277_v53 = vrot.slane %v1000_v43, %v3172_v48  ;;  %v849_v51 = vpack.c.bf16 %v615_v63, %v612_v33  ;;  %v1203_v63 = vadd.s32 4294967176, %v2646_v17 }
 0x13d   :  { %v1273_v58 = vsel %vm1187_vm13, %v1272_v45, %v3127_v29  ;;  %v1029_v52 = vunpack.c.l.b16 %v849_v51  ;;  %v1030_v55 = vunpack.c.h.b16 %v849_v51  ;;  %v705_v61 = vpop.xlane.xlu1 %704  ;;  %v3233_v45 = vsub.s32 %v1196_v12, %v2658_v56 }
 0x13e   :  { %v3191_v57 = vsel %vm1194_vm14, %v1277_v53, %v1273_v58  ;;  %v702_v21 = vpop.xlane.xlu0 %701  ;;  %v3236_v58 = vsub.s32 %v1203_v63, %v2658_v56 }
 0x13f   :  { %v1420_v50 = vrot.slane %v1029_v52, %v3091_v44  ;;  %v1425_v24 = vrot.slane %v1030_v55, %v3099_v46  ;;  %v864_v49 = vpack.c.bf16 %v705_v61, %v702_v21 }
 0x141   :  { %v1421_v23 = vsel %vm1173_vm10, %v1420_v50, %v3134_v39  ;;  %v1059_v0 = vunpack.c.l.b16 %v864_v49  ;;  %v1060_v2 = vunpack.c.h.b16 %v864_v49  ;;  %v795_v29 = vpop.xlane.xlu1 %794 }
 0x142   :  { %v3198_v5 = vsel %vm1180_vm11, %v1425_v24, %v1421_v23  ;;  %v792_v8 = vpop.xlane.xlu0 %791 }
 0x143   :  { %v1568_v9 = vrot.slane %v1059_v0, %v2992_v6  ;;  %v1573_v26 = vrot.slane %v1060_v2, %v2995_v47  ;;  %v879_v11 = vpack.c.bf16 %v795_v29, %v792_v8 }
 0x145   :  { %v1569_v41 = vsel %vm1159_vm8, %v1568_v9, %v3141_v62  ;;  %v1089_v13 = vunpack.c.l.b16 %v879_v11  ;;  %v1090_v14 = vunpack.c.h.b16 %v879_v11  ;;  %v573_v39 = vpop.xlane.xlu1 %572 }
 0x146   :  { %v3205_v15 = vsel %vm1166_vm9, %v1573_v26, %v1569_v41  ;;  %v570_v16 = vpop.xlane.xlu0 %569 }
 0x147   :  { %v1716_v42 = vrot.slane %v1089_v13, %v2864_v37  ;;  %v1721_v19 = vrot.slane %v1090_v14, %v2867_v60  ;;  %v842_v7 = vpack.c.bf16 %v573_v39, %v570_v16 }
 0x149   :  { %v1717_v22 = vsel %vm1145_vm6, %v1716_v42, %v3148_v34  ;;  %v1015_v27 = vunpack.c.l.b16 %v842_v7  ;;  %v1016_v28 = vunpack.c.h.b16 %v842_v7  ;;  %v663_v62 = vpop.xlane.xlu1 %662  ;;  %vm1773_vm6 = vcmask 1046534  }
 0x14a   :  { %v3212_v18 = vsel %vm1152_vm7, %v1721_v19, %v1717_v22  ;;  %v660_v30 = vpop.xlane.xlu0 %659  ;;  %vm1775_vm7 = vcmask 1047559  }
 0x14b   :  { %v1351_v59 = vrot.slane %v1015_v27, %v3167_v25  ;;  %v1356_v31 = vrot.slane %v1016_v28, %v3172_v48  ;;  %v857_v3 = vpack.c.bf16 %v663_v62, %v660_v30 }
 0x14d   :  { %v1352_v37 = vsel %vm1187_vm13, %v1351_v59, %v3155_v10  ;;  %v1045_v60 = vunpack.c.l.b16 %v857_v3  ;;  %v1046_v35 = vunpack.c.h.b16 %v857_v3  ;;  %v3219_v34 = vpop.xlane.xlu1 %752 }
 0x14e   :  { %v1357_v36 = vsel %vm1194_vm14, %v1356_v31, %v1352_v37  ;;  %v3221_v38 = vpop.xlane.xlu0 %749 }
 0x14f   :  { %v1499_v1 = vrot.slane %v1045_v60, %v3091_v44  ;;  %v1504_v40 = vrot.slane %v1046_v35, %v3099_v46 }
 0x151   :  { %v1500_v54 = vsel %vm1173_vm10, %v1499_v1, %v3164_v20  ;;  %v483_v10 = vpop.xlane.xlu1 %482 }
 0x152   :  { %v3229_v43 = vsel %vm1180_vm11, %v1504_v40, %v1500_v54  ;;  %v480_v33 = vpop.xlane.xlu0 %479 }
 0x153   :  { %v827_v53 = vpack.c.bf16 %v483_v10, %v480_v33 }
 0x155   :  { %v985_v51 = vunpack.c.l.b16 %v827_v53  ;;  %v986_v52 = vunpack.c.h.b16 %v827_v53  ;;  %v531_v55 = vpop.xlane.xlu1 %530 }
 0x156   :  { %v528_v61 = vpop.xlane.xlu0 %527 }
 0x157   :  { %v1200_v20 = vrot.slane %v985_v51, %v3233_v45  ;;  %v835_v21 = vpack.c.bf16 %v531_v55, %v528_v61  ;;  %v1207_v17 = vrot.slane %v986_v52, %v3236_v58 }
 0x159   :  { %v1001_v50 = vunpack.c.l.b16 %v835_v21  ;;  %v1002_v24 = vunpack.c.h.b16 %v835_v21  ;;  %v621_v49 = vpop.xlane.xlu1 %620  ;;  %v1202_v0 = vsel %vm1201_vm15, %v1200_v20, %v3184_v4 }
 0x15a   :  { %v618_v23 = vpop.xlane.xlu0 %617  ;;  %v1209_v8 = vsel %vm1208_vm0, %v1207_v17, %v1202_v0 }
 0x15b   :  { %v1282_v56 = vrot.slane %v1001_v50, %v3233_v45  ;;  %v1287_v2 = vrot.slane %v1002_v24, %v3236_v58  ;;  %v850_v42 = vpack.c.bf16 %v621_v49, %v618_v23  ;;  %v872_v24 = vpack.c.bf16 %v3219_v34, %v3221_v38 }
 0x15d   :  { %v1283_v29 = vsel %vm1201_vm15, %v1282_v56, %v3191_v57  ;;  %v711_v26 = vpop.xlane.xlu1 %710  ;;  %v1031_v62 = vunpack.c.l.b16 %v850_v42  ;;  %v1032_v60 = vunpack.c.h.b16 %v850_v42 }
 0x15e   :  { %v1288_v9 = vsel %vm1208_vm0, %v1287_v2, %v1283_v29  ;;  %v708_v11 = vpop.xlane.xlu0 %707 }
 0x15f   :  { %v1764_v41 = vsel %vm1763_vm1, %v1288_v9, %v1209_v8  ;;  %v1430_v35 = vrot.slane %v1031_v62, %v3167_v25  ;;  %v1435_v54 = vrot.slane %v1032_v60, %v3172_v48  ;;  %v865_v20 = vpack.c.bf16 %v711_v26, %v708_v11 }
 0x160   :  { %v1075_v8 = vunpack.c.l.b16 %v872_v24 }
 0x161   :  { %v801_v13 = vpop.xlane.xlu1 %800  ;;  %v1431_v10 = vsel %vm1187_vm13, %v1430_v35, %v3198_v5  ;;  %v1061_v0 = vunpack.c.l.b16 %v865_v20 }
 0x162   :  { %v798_v14 = vpop.xlane.xlu0 %797  ;;  %v1436_v61 = vsel %vm1194_vm14, %v1435_v54, %v1431_v10 }
 0x163   :  { %v880_v9 = vpack.c.bf16 %v801_v13, %v798_v14  ;;  %v1578_v34 = vrot.slane %v1061_v0, %v3091_v44 }
 0x165   :  { %v579_v39 = vpop.xlane.xlu1 %578  ;;  %v1579_v60 = vsel %vm1173_vm10, %v1578_v34, %v3205_v15 }
 0x166   :  { %v576_v16 = vpop.xlane.xlu0 %575 }
 0x167   :  { %v843_v4 = vpack.c.bf16 %v579_v39, %v576_v16 }
 0x169   :  { %v1017_v19 = vunpack.c.l.b16 %v843_v4  ;;  %v1018_v7 = vunpack.c.h.b16 %v843_v4  ;;  %v669_v22 = vpop.xlane.xlu1 %668  ;;  %v1062_v4 = vunpack.c.h.b16 %v865_v20 }
 0x16a   :  { %v666_v27 = vpop.xlane.xlu0 %665 }
 0x16b   :  { %v1361_v28 = vrot.slane %v1017_v19, %v3233_v45  ;;  %v1366_v57 = vrot.slane %v1018_v7, %v3236_v58  ;;  %v858_v63 = vpack.c.bf16 %v669_v22, %v666_v27  ;;  %v1647_v27 = vrot.slane %v1075_v8, %v2992_v6 }
 0x16d   :  { %v1362_v30 = vsel %vm1201_vm15, %v1361_v28, %v1357_v36  ;;  %v759_v31 = vpop.xlane.xlu1 %758  ;;  %v1047_v21 = vunpack.c.l.b16 %v858_v63  ;;  %v1048_v56 = vunpack.c.h.b16 %v858_v63  ;;  %v1091_v28 = vunpack.c.l.b16 %v880_v9 }
 0x16e   :  { %v1367_v59 = vsel %vm1208_vm0, %v1366_v57, %v1362_v30  ;;  %v756_v3 = vpop.xlane.xlu0 %755 }
 0x16f   :  { %v1766_v37 = vsel %vm1765_vm2, %v1367_v59, %v1764_v41  ;;  %v1509_v2 = vrot.slane %v1047_v21, %v3167_v25  ;;  %v1076_v41 = vunpack.c.h.b16 %v872_v24  ;;  %v873_v39 = vpack.c.bf16 %v759_v31, %v756_v3 }
 0x170   :  { %v1514_v38 = vrot.slane %v1048_v56, %v3172_v48  ;;  %v1583_v31 = vrot.slane %v1062_v4, %v3099_v46  ;;  %v1726_v54 = vrot.slane %v1091_v28, %v2992_v6 }
 0x171   :  { %v627_v1 = vpop.xlane.xlu1 %626  ;;  %v1510_v42 = vsel %vm1187_vm13, %v1509_v2, %v3229_v43  ;;  %v1652_v57 = vrot.slane %v1076_v41, %v2995_v47  ;;  %v1077_v62 = vunpack.c.l.b16 %v873_v39  ;;  %v1078_v10 = vunpack.c.h.b16 %v873_v39 }
 0x172   :  { %v624_v40 = vpop.xlane.xlu0 %623  ;;  %v1515_v43 = vsel %vm1194_vm14, %v1514_v38, %v1510_v42 }
 0x173   :  { %v851_v12 = vpack.c.bf16 %v627_v1, %v624_v40 }
 0x175   :  { %v1033_v33 = vunpack.c.l.b16 %v851_v12  ;;  %v1034_v53 = vunpack.c.h.b16 %v851_v12  ;;  %v717_v36 = vpop.xlane.xlu1 %716  ;;  %v1092_v12 = vunpack.c.h.b16 %v880_v9 }
 0x176   :  { %v714_v51 = vpop.xlane.xlu0 %713 }
 0x177   :  { %v1440_v52 = vrot.slane %v1033_v33, %v3233_v45  ;;  %v1445_v55 = vrot.slane %v1034_v53, %v3236_v58  ;;  %v866_v29 = vpack.c.bf16 %v717_v36, %v714_v51  ;;  %v1648_v36 = vsel %vm1159_vm8, %v1647_v27, %v3177_v32 }
 0x178   :  { %v1657_v51 = vrot.slane %v1077_v62, %v3091_v44  ;;  %v1727_v32 = vsel %vm1159_vm8, %v1726_v54, %v3212_v18 }
 0x179   :  { %v1441_v50 = vsel %vm1201_vm15, %v1440_v52, %v1436_v61  ;;  %v807_v17 = vpop.xlane.xlu1 %806  ;;  %v1063_v19 = vunpack.c.l.b16 %v866_v29  ;;  %v1064_v3 = vunpack.c.h.b16 %v866_v29 }
 0x17a   :  { %v1446_v5 = vsel %vm1208_vm0, %v1445_v55, %v1441_v50  ;;  %v804_v49 = vpop.xlane.xlu0 %803  ;;  %v1584_v55 = vsel %vm1180_vm11, %v1583_v31, %v1579_v60 }
 0x17b   :  { %v1768_v23 = vsel %vm1767_vm3, %v1446_v5, %v1766_v37  ;;  %v881_v37 = vpack.c.bf16 %v807_v17, %v804_v49  ;;  %v1588_v35 = vrot.slane %v1063_v19, %v3167_v25  ;;  %v1593_v61 = vrot.slane %v1064_v3, %v3172_v48 }
 0x17c   :  { %v1653_v5 = vsel %vm1166_vm9, %v1652_v57, %v1648_v36  ;;  %v1731_v17 = vrot.slane %v1092_v12, %v2995_v47  ;;  %v1662_v49 = vrot.slane %v1078_v10, %v3099_v46 }
 0x17d   :  { %v675_v26 = vpop.xlane.xlu1 %674  ;;  %v1093_v20 = vunpack.c.l.b16 %v881_v37  ;;  %v1589_v6 = vsel %vm1187_vm13, %v1588_v35, %v1584_v55  ;;  %v1658_v56 = vsel %vm1173_vm10, %v1657_v51, %v1653_v5 }
 0x17e   :  { %v672_v11 = vpop.xlane.xlu0 %671  ;;  %v1594_v9 = vsel %vm1194_vm14, %v1593_v61, %v1589_v6  ;;  %v1732_v38 = vsel %vm1166_vm9, %v1731_v17, %v1727_v32  ;;  %v1663_v42 = vsel %vm1180_vm11, %v1662_v49, %v1658_v56 }
 0x17f   :  { %v859_v16 = vpack.c.bf16 %v675_v26, %v672_v11  ;;  %v1094_v26 = vunpack.c.h.b16 %v881_v37  ;;  %v1736_v11 = vrot.slane %v1093_v20, %v3091_v44 }
 0x181   :  { %v1049_v7 = vunpack.c.l.b16 %v859_v16  ;;  %v1050_v22 = vunpack.c.h.b16 %v859_v16  ;;  %v765_v13 = vpop.xlane.xlu1 %764  ;;  %v1741_v44 = vrot.slane %v1094_v26, %v3099_v46 }
 0x182   :  { %v762_v14 = vpop.xlane.xlu0 %761 }
 0x183   :  { %v1519_v30 = vrot.slane %v1049_v7, %v3233_v45  ;;  %v1524_v59 = vrot.slane %v1050_v22, %v3236_v58  ;;  %v874_v40 = vpack.c.bf16 %v765_v13, %v762_v14  ;;  %v1737_v22 = vsel %vm1173_vm10, %v1736_v11, %v1732_v38 }
 0x184   :  { %v1742_v37 = vsel %vm1180_vm11, %v1741_v44, %v1737_v22 }
 0x185   :  { %v1520_v1 = vsel %vm1201_vm15, %v1519_v30, %v1515_v43  ;;  %v723_v33 = vpop.xlane.xlu1 %722  ;;  %v1079_v21 = vunpack.c.l.b16 %v874_v40  ;;  %v1080_v41 = vunpack.c.h.b16 %v874_v40 }
 0x186   :  { %v1525_v63 = vsel %vm1208_vm0, %v1524_v59, %v1520_v1  ;;  %v720_v53 = vpop.xlane.xlu0 %719 }
 0x187   :  { %v867_v52 = vpack.c.bf16 %v723_v33, %v720_v53  ;;  %v1770_v15 = vsel %vm1769_vm4, %v1525_v63, %v1768_v23  ;;  %v1667_v18 = vrot.slane %v1079_v21, %v3167_v25  ;;  %v1672_v27 = vrot.slane %v1080_v41, %v3172_v48 }
 0x189   :  { %v1065_v50 = vunpack.c.l.b16 %v867_v52  ;;  %v1066_v24 = vunpack.c.h.b16 %v867_v52  ;;  %v813_v23 = vpop.xlane.xlu1 %812  ;;  %v1668_v13 = vsel %vm1187_vm13, %v1667_v18, %v1663_v42  ;;  %v1882_v52 = vld [vmem:[%s3339_s3] ss:$0 sm:$0xff] }
 0x18a   :  { %v810_v0 = vpop.xlane.xlu0 %809  ;;  %v1673_v46 = vsel %vm1194_vm14, %v1672_v27, %v1668_v13 }
 0x18b   :  { %v1598_v2 = vrot.slane %v1065_v50, %v3233_v45  ;;  %v1603_v29 = vrot.slane %v1066_v24, %v3236_v58  ;;  %v882_v8 = vpack.c.bf16 %v813_v23, %v810_v0 }
 0x18d   :  { %v1599_v47 = vsel %vm1201_vm15, %v1598_v2, %v1594_v9  ;;  %v1095_v39 = vunpack.c.l.b16 %v882_v8  ;;  %v771_v4 = vpop.xlane.xlu1 %770  ;;  %v1096_v28 = vunpack.c.h.b16 %v882_v8 }
 0x18e   :  { %v1604_v16 = vsel %vm1208_vm0, %v1603_v29, %v1599_v47  ;;  %v768_v34 = vpop.xlane.xlu0 %767 }
 0x18f   :  { %v875_v19 = vpack.c.bf16 %v771_v4, %v768_v34  ;;  %v1772_v7 = vsel %vm1771_vm5, %v1604_v16, %v1770_v15  ;;  %v1746_v14 = vrot.slane %v1095_v39, %v3167_v25  ;;  %v1751_v60 = vrot.slane %v1096_v28, %v3172_v48 }
 0x191   :  { %v1081_v57 = vunpack.c.l.b16 %v875_v19  ;;  %v1082_v62 = vunpack.c.h.b16 %v875_v19  ;;  %v819_v30 = vpop.xlane.xlu1 %818  ;;  %v1747_v35 = vsel %vm1187_vm13, %v1746_v14, %v1742_v37 }
 0x192   :  { %v816_v59 = vpop.xlane.xlu0 %815  ;;  %v1752_v33 = vsel %vm1194_vm14, %v1751_v60, %v1747_v35 }
 0x193   :  { %v1677_v31 = vrot.slane %v1081_v57, %v3233_v45  ;;  %v1682_v43 = vrot.slane %v1082_v62, %v3236_v58  ;;  %v883_v3 = vpack.c.bf16 %v819_v30, %v816_v59 }
 0x195   :  { %v1678_v25 = vsel %vm1201_vm15, %v1677_v31, %v1673_v46  ;;  %v1097_v1 = vunpack.c.l.b16 %v883_v3  ;;  %v1098_v40 = vunpack.c.h.b16 %v883_v3 }
 0x196   :  { %v1683_v12 = vsel %vm1208_vm0, %v1682_v43, %v1678_v25 }
 0x197   :  { %v1756_v54 = vrot.slane %v1097_v1, %v3233_v45  ;;  %v1761_v10 = vrot.slane %v1098_v40, %v3236_v58  ;;  %v1774_v63 = vsel %vm1773_vm6, %v1683_v12, %v1772_v7 }
 0x199   :  { %v1757_v53 = vsel %vm1201_vm15, %v1756_v54, %v1752_v33 }
 0x19a   :  { %v1762_v48 = vsel %vm1208_vm0, %v1761_v10, %v1757_v53 }
 0x19b   :  { %v1776_v36 = vsel %vm1775_vm7, %v1762_v48, %v1774_v63 }
 0x19c   :  { %v1777_v51 = vpack.c.b16 %v1776_v36, %v1776_v36 }
 0x19e   :  { %2275 = vmatmul.mubr.bf16.vlgmr.msra.gmra.mrb[0].mxu0 %v1777_v51 }
 0x271   :  { %v1861_v45 = vpop.f32.mrb[0].mxu0 }
 0x272   :  { %v1862_v15 = vadd.f32 %v1882_v52, %v1861_v45  ;;  %v2276_v58 = vpop.f32.mrb[1].mxu0 }
 0x273   :  { %v1864_v55 = vpop.f32.mrb[2].mxu0 }
 0x274   :  { %1867 = vst [vmem:[#allocation2] sm:$0xff] %v1862_v15  ;;  %v2277_v61 = vpop.f32.mrb[3].mxu0 }
 0x275   :  { %2300 = shalt.err (!%p2297_p4)
}
 0x276   :  { %s2301_s3 = scalar_lea.hbm %s3340_s4, 128 }
 0x277   :  { %p2302_p5 = scmp.ne.s32.totalorder %s3340_s4, %s2301_s3  ;;  %p2305_p6 = scmp.lt.u32.totalorder %s2301_s3, %s3340_s4 }
 0x279   :  { %p2307_p7 = pnand %p2305_p6, %p2302_p5 }
 0x27b   :  { %2310 = shalt.err (!%p2307_p7)
}
 0x27c   :  { %1877 = dma.vmem_to_hbm [thread:$0]  %s1875_s18, 128, %s3340_s4, [#allocation3]  }
 0x27d   :  { %2311 = dma.done.wait [#allocation3], 128  }
 0x27e   :  { %2312 = vsyncadd [#allocation3], 4294967168 }
 0x27f   :  { %1881 = vsyncpa [#allocation3], 1 }

</bundles_post_ra>
